<compile_context>
chip_gen: v6e
topology: v6e:2x2x1
jax: 0.10.0
libtpu: 0.0.40
codegen_flags: <defaults>
</compile_context>

<pallas_src>
import functools

import jax
import jax.numpy as jnp
from jax.experimental import pallas as pl
from jax.experimental.pallas import tpu as pltpu

# Above the 16/32 MiB scoped defaults, with headroom under v7x's 64 MiB physical VMEM.
_VMEM_LIMIT_BYTES = 48 * 1024 * 1024


def _round_up(x, m):
    return ((x + m - 1) // m) * m


# ---------------------------------------------------------------------------
# Parallel tiled matmul + bias:  out = x @ w + b
# bf16 MXU operands, f32 accumulation + f32 bias add, configurable output dtype.
# Non-divisible M / N are zero-padded to the tile grid and sliced afterwards, so
# no block ever silently falls back to a full (K, V)-sized tile.
# ---------------------------------------------------------------------------
def _matmul_bias_kernel(x_ref, w_ref, b_ref, o_ref):
    acc = jnp.dot(x_ref[...].astype(jnp.bfloat16),
                  w_ref[...].astype(jnp.bfloat16),
                  preferred_element_type=jnp.float32)
    o_ref[...] = (acc + b_ref[...]).astype(o_ref.dtype)


def _matmul_bias(x, w, b, *, tm_target=256, tn_target=256, out_dtype=jnp.float32):
    M, K = x.shape
    K2, N = w.shape
    assert K == K2 and b.shape == (1, N)
    tm = min(tm_target, _round_up(M, 8))
    tn = min(tn_target, _round_up(N, 128))
    Mp = _round_up(M, tm)
    Np = _round_up(N, tn)
    if Mp != M:
        x = jnp.pad(x, ((0, Mp - M), (0, 0)))
    if Np != N:
        w = jnp.pad(w, ((0, 0), (0, Np - N)))
        b = jnp.pad(b, ((0, 0), (0, Np - N)))

    out = pl.pallas_call(
        _matmul_bias_kernel,
        out_shape=jax.ShapeDtypeStruct((Mp, Np), out_dtype),
        grid_spec=pltpu.PrefetchScalarGridSpec(
            num_scalar_prefetch=0,
            grid=(Mp // tm, Np // tn),
            in_specs=[
                pl.BlockSpec((tm, K), lambda i, j: (i, 0)),
                pl.BlockSpec((K, tn), lambda i, j: (0, j)),
                pl.BlockSpec((1, tn), lambda i, j: (0, j)),
            ],
            out_specs=pl.BlockSpec((tm, tn), lambda i, j: (i, j)),
        ),
        compiler_params=pltpu.CompilerParams(
            dimension_semantics=("parallel", "parallel"),
            vmem_limit_bytes=_VMEM_LIMIT_BYTES,
        ),
    )(x, w, b)

    if Mp != M or Np != N:
        out = out[:M, :N]
    return out


# ---------------------------------------------------------------------------
# Sequential GRU recurrence, time-major, batch-tiled.
#   gi   : (T, B, 3H) bf16   precomputed x W_i^T + (b_ir+b_hr | b_iz+b_hz | b_in)
#   w_h  : (H, 3H)    bf16   fused [W_hr^T | W_hz^T | W_hn^T]  (ANY space, DMA'd once)
#   b_hn : (1, H)     f32
#   h0   : (B, H)     f32
# Outputs: hs (T, B, H) bf16 (full hidden sequence), h_last (B, H) f32.
# ---------------------------------------------------------------------------
def _gru_chunk_kernel(gi_ref, wh_hbm_ref, bhn_ref, h0_ref, hs_ref, hlast_ref,
                      wh_vmem, wh_sem, h_scratch, *, tc, hidden):
    t = pl.program_id(1)

    @pl.when(t == 0)
    def _():
        # Fetch the fused recurrent weight once per batch-tile into a single VMEM copy
        # (instead of a double-buffered pipelined input), and reset the carried state.
        cp = pltpu.make_async_copy(wh_hbm_ref, wh_vmem, wh_sem)
        cp.start()
        cp.wait()
        h_scratch[...] = h0_ref[...]

    H = hidden
    h = h_scratch[...]                                    # (tb, H) f32 carried state
    wh = wh_vmem[...]                                     # (H, 3H) bf16, resident
    bhn = jnp.broadcast_to(bhn_ref[...], h.shape)         # hoisted out of the unrolled loop

    # Statically unrolled inner loop over the time chunk (tc is a trace-time const).
    for s in range(tc):
        gi = gi_ref[s].astype(jnp.float32)                # (tb, 3H), dense time-major load
        gh = jnp.dot(h.astype(jnp.bfloat16), wh,          # single fused bf16 MXU push
                     preferred_element_type=jnp.float32)
        # PyTorch GRU gate math, gate order (r, z, n); r/z biases pre-folded into gi,
        # b_in lives in gi_n, b_hn stays inside r * (.). Gate math kept in f32.
        r = jax.nn.sigmoid(gi[:, 0:H] + gh[:, 0:H])
        z = jax.nn.sigmoid(gi[:, H:2 * H] + gh[:, H:2 * H])
        n = jnp.tanh(gi[:, 2 * H:3 * H] + r * (gh[:, 2 * H:3 * H] + bhn))
        h = (1.0 - z) * n + z * h
        hs_ref[s] = h.astype(hs_ref.dtype)                # dense (tb, H) store

    h_scratch[...] = h
    hlast_ref[...] = h      # flushed to HBM after this batch-tile's last time chunk


def _pick_time_chunk(T, max_chunk=32):
    # Largest divisor of T up to max_chunk (sweepable: 32/64) — amortizes the ~0.35us
    # per-grid-step overhead. The time axis is the leading dim of the (tc, tb, 3H)
    # block, so it carries no (8,128) constraint.
    for tc in range(min(max_chunk, T), 0, -1):
        if T % tc == 0:
            return tc
    return T


def _pick_batch_tile(B):
    # Two batch tiles (one per TensorCore on v7x megacore) when the half-batch stays
    # sublane-aligned; otherwise keep the whole (already 8-padded) batch in one tile.
    if B % 2 == 0 and (B // 2) % 8 == 0:
        return B // 2
    return B


def _gru_recurrence(gi, w_h, b_hn, h0, *, hs_dtype=jnp.bfloat16):
    T, B, H3 = gi.shape
    H = h0.shape[-1]
    tb = _pick_batch_tile(B)
    tc = _pick_time_chunk(T)
    grid = (B // tb, T // tc)

    kernel = functools.partial(_gru_chunk_kernel, tc=tc, hidden=H)

    hs, h_last = pl.pallas_call(
        kernel,
        out_shape=(
            jax.ShapeDtypeStruct((T, B, H), hs_dtype),
            jax.ShapeDtypeStruct((B, H), jnp.float32),
        ),
        grid_spec=pltpu.PrefetchScalarGridSpec(
            num_scalar_prefetch=0,
            grid=grid,
            in_specs=[
                pl.BlockSpec((tc, tb, H3), lambda b, t: (t, b, 0)),   # gi chunk (time-major)
                pl.BlockSpec(memory_space=pl.ANY),                    # fused W_h, DMA'd once
                pl.BlockSpec((1, H), lambda b, t: (0, 0)),            # b_hn (tiny)
                pl.BlockSpec((tb, H), lambda b, t: (b, 0)),           # h0 (tiny)
            ],
            out_specs=(
                pl.BlockSpec((tc, tb, H), lambda b, t: (t, b, 0)),    # hidden sequence
                pl.BlockSpec((tb, H), lambda b, t: (b, 0)),           # final hidden state
            ),
            scratch_shapes=[
                pltpu.VMEM((H, H3), w_h.dtype),     # single resident copy of fused W_h
                pltpu.SemaphoreType.DMA(()),        # its copy semaphore
                pltpu.VMEM((tb, H), jnp.float32),   # carried hidden state (f32)
            ],
        ),
        compiler_params=pltpu.CompilerParams(
            dimension_semantics=("parallel", "arbitrary"),  # batch parallel, time serial
            vmem_limit_bytes=_VMEM_LIMIT_BYTES,
        ),
    )(gi, w_h, b_hn, h0)
    return hs, h_last


# ---------------------------------------------------------------------------
# Full decoder forward (eval mode).
# ---------------------------------------------------------------------------
@jax.jit
def decoder_forward(input_token, hidden, params):
    """input_token: (B, T) int32, hidden: (1, B, H) f32.
    Returns (prediction (B, T, V) bf16, hidden (1, B, H) f32)."""
    B, T = input_token.shape
    H = hidden.shape[-1]
    V = params["b_out"].shape[-1]

    # Pad batch to a sublane multiple (8): every per-step vreg / MXU tile in the
    # recurrence stays dense; padded rows are sliced away before the fc_out matmul.
    Bp = _round_up(B, 8)
    if Bp != B:
        input_token = jnp.pad(input_token, ((0, Bp - B), (0, 0)))   # pad_idx tokens
        hidden = jnp.pad(hidden, ((0, 0), (0, Bp - B), (0, 0)))

    # Embedding gather, time-major, cast to bf16 for the MXU.
    # Dropout: identity (eval-mode forward).
    # TODO(synk): training-mode dropout RNG not modeled.
    tok_tm = input_token.T                                           # (T, Bp)
    embedded = jnp.take(params["embedding"], tok_tm, axis=0).astype(jnp.bfloat16)  # (T,Bp,E)
    E = embedded.shape[-1]

    # (1) Input-gate projections for ALL timesteps: one parallel bf16 MXU matmul,
    #     gi kept in bf16 for its HBM round trip.
    gi = _matmul_bias(embedded.reshape(T * Bp, E), params["w_i_cat"], params["b_i_fold"],
                      tm_target=256, tn_target=256, out_dtype=jnp.bfloat16)
    gi = gi.reshape(T, Bp, 3 * H)

    # (2) Sequential GRU recurrence: only the truly serial work stays serial.
    h0 = hidden[0].astype(jnp.float32)                               # (Bp, H)
    hs, h_last = _gru_recurrence(gi, params["w_h_cat"], params["b_hn"], h0)

    # (3) fc_out projection for ALL timesteps: parallel bf16 MXU matmul with a tall M
    #     tile so W_out (the largest weight) is re-streamed as little as possible.
    #     Output emitted in bf16 (set out_dtype=jnp.float32 for exact PyTorch dtype parity).
    hs_bt = jnp.transpose(hs[:, :B, :], (1, 0, 2)).reshape(B * T, H)  # (B*T, H) bf16
    pred = _matmul_bias(hs_bt, params["w_out_t"], params["b_out"],
                        tm_target=512, tn_target=512, out_dtype=jnp.bfloat16)
    prediction = pred.reshape(B, T, V)

    return prediction, h_last[:B][None]                               # ((B,T,V), (1,B,H))


def init_params(key, vocab, embed, hidden, pad_idx=0):
    """Deterministic synthetic init matching PyTorch parameter shapes, pre-fused,
    with matmul weights stored in bf16 (biases / embedding table stay f32)."""
    keys = jax.random.split(key, 7)
    k_rng = 1.0 / jnp.sqrt(hidden)

    # nn.Embedding: N(0,1), padding row zeroed.
    emb = jax.random.normal(keys[0], (vocab, embed), jnp.float32)
    emb = emb.at[pad_idx].set(0.0)

    # nn.GRU weights: uniform(-1/sqrt(H), 1/sqrt(H)); gate order (r, z, n).
    w_ih = jax.random.uniform(keys[1], (3 * hidden, embed), jnp.float32, -k_rng, k_rng)
    w_hh = jax.random.uniform(keys[2], (3 * hidden, hidden), jnp.float32, -k_rng, k_rng)
    b_ih = jax.random.uniform(keys[3], (3 * hidden,), jnp.float32, -k_rng, k_rng)
    b_hh = jax.random.uniform(keys[4], (3 * hidden,), jnp.float32, -k_rng, k_rng)

    # nn.Linear(hidden, vocab)
    w_out = jax.random.uniform(keys[5], (vocab, hidden), jnp.float32, -k_rng, k_rng)
    b_out = jax.random.uniform(keys[6], (vocab,), jnp.float32, -k_rng, k_rng)

    H = hidden
    w_ir, w_iz, w_in = w_ih[0:H], w_ih[H:2 * H], w_ih[2 * H:3 * H]
    w_hr, w_hz, w_hn = w_hh[0:H], w_hh[H:2 * H], w_hh[2 * H:3 * H]
    b_ir, b_iz, b_in_ = b_ih[0:H], b_ih[H:2 * H], b_ih[2 * H:3 * H]
    b_hr, b_hz, b_hn = b_hh[0:H], b_hh[H:2 * H], b_hh[2 * H:3 * H]

    return {
        "embedding": emb,                                                     # (V, E) f32
        # fused, pre-transposed input projection (bf16): x (T*B,E) @ w_i_cat (E,3H)
        "w_i_cat": jnp.concatenate([w_ir.T, w_iz.T, w_in.T], axis=1).astype(jnp.bfloat16),
        # folded biases (f32): [b_ir+b_hr | b_iz+b_hz | b_in]  (b_hn must stay separate)
        "b_i_fold": jnp.concatenate([b_ir + b_hr, b_iz + b_hz, b_in_])[None, :],
        # fused, pre-transposed hidden projection (bf16): h (tb,H) @ w_h_cat (H,3H)
        "w_h_cat": jnp.concatenate([w_hr.T, w_hz.T, w_hn.T], axis=1).astype(jnp.bfloat16),
        "b_hn": b_hn[None, :],                                                # (1, H) f32
        # fc_out
        "w_out_t": w_out.T.astype(jnp.bfloat16),                              # (H, V) bf16
        "b_out": b_out[None, :],                                              # (1, V) f32
    }


if __name__ == "__main__":
    VOCAB, EMBED, HIDDEN = 32, 16, 32
    BATCH, SEQ = 2, 8

    key = jax.random.PRNGKey(0)
    k_par, k_tok, k_hid = jax.random.split(key, 3)

    params = init_params(k_par, VOCAB, EMBED, HIDDEN, pad_idx=0)
    input_token = jax.random.randint(k_tok, (BATCH, SEQ), 0, VOCAB, dtype=jnp.int32)
    hidden = jax.random.normal(k_hid, (1, BATCH, HIDDEN), jnp.float32)

    prediction, new_hidden = decoder_forward(input_token, hidden, params)
    jax.block_until_ready((prediction, new_hidden))

    assert prediction.shape == (BATCH, SEQ, VOCAB)
    assert new_hidden.shape == (1, BATCH, HIDDEN)
    assert bool(jnp.isfinite(prediction.astype(jnp.float32)).all())
    assert bool(jnp.isfinite(new_hidden).all())
    print("KERNEL_OK")
</pallas_src>

<mosaic_0001>
module attributes {stable_mosaic.version = 11 : i64} {
  func.func @_matmul_bias_kernel(%arg0: i32, %arg1: i32, %arg2: memref<64x16xbf16, #tpu.memory_space<vmem>>, %arg3: memref<16x128xbf16, #tpu.memory_space<vmem>>, %arg4: memref<1x128xf32, #tpu.memory_space<vmem>>, %arg5: memref<64x128xbf16, #tpu.memory_space<vmem>>) attributes {dimension_semantics = [#tpu.dimension_semantics<parallel>, #tpu.dimension_semantics<parallel>], iteration_bounds = array<i64: 1, 1>, scalar_prefetch = 0 : i64, scratch_operands = 0 : i64, tpu.core_type = #tpu.core_type<tc>, window_params = [{transform_indices = @transform_0, window_bounds = array<i64: 64, 16>}, {transform_indices = @transform_1, window_bounds = array<i64: 16, 128>}, {transform_indices = @transform_2, window_bounds = array<i64: 1, 128>}, {transform_indices = @transform_3, window_bounds = array<i64: 64, 128>}]} {
    %c0 = arith.constant 0 : index
    %c0_0 = arith.constant 0 : index
    %0 = vector.load %arg2[%c0, %c0_0] : memref<64x16xbf16, #tpu.memory_space<vmem>>, vector<64x16xbf16>
    %c0_1 = arith.constant 0 : index
    %c0_2 = arith.constant 0 : index
    %1 = vector.load %arg3[%c0_1, %c0_2] : memref<16x128xbf16, #tpu.memory_space<vmem>>, vector<16x128xbf16>
    %cst = arith.constant dense<0.000000e+00> : vector<64x128xf32>
    %2 = tpu.matmul %0, %1, %cst {dimension_numbers = #tpu.dot_dimension_numbers<[1], [0], [0], [1], [0, 0, 1, 1], [], []>} : vector<64x16xbf16>, vector<16x128xbf16>, vector<64x128xf32> -> vector<64x128xf32>
    %c0_3 = arith.constant 0 : index
    %c0_4 = arith.constant 0 : index
    %3 = vector.load %arg4[%c0_3, %c0_4] : memref<1x128xf32, #tpu.memory_space<vmem>>, vector<1x128xf32>
    %4 = vector.broadcast %3 : vector<1x128xf32> to vector<64x128xf32>
    %5 = arith.addf %2, %4 : vector<64x128xf32>
    %6 = arith.truncf %5 : vector<64x128xf32> to vector<64x128xbf16>
    %c0_5 = arith.constant 0 : index
    %c0_6 = arith.constant 0 : index
    %7 = vector.load %arg5[%c0_5, %c0_6] : memref<64x128xbf16, #tpu.memory_space<vmem>>, vector<64x128xbf16>
    tpu.vector_store %arg5[%c0_5, %c0_6], %6 {strides = array<i32>} : memref<64x128xbf16, #tpu.memory_space<vmem>>, vector<64x128xbf16>,
    return
  }
  func.func @transform_0(%arg0: i32, %arg1: i32) -> (i32, i32) {
    %c0_i32 = arith.constant 0 : i32
    %c0_i32_0 = arith.constant 0 : i32
    return %arg0, %c0_i32 : i32, i32
  }
  func.func @transform_1(%arg0: i32, %arg1: i32) -> (i32, i32) {
    %c0_i32 = arith.constant 0 : i32
    %c0_i32_0 = arith.constant 0 : i32
    return %c0_i32, %arg1 : i32, i32
  }
  func.func @transform_2(%arg0: i32, %arg1: i32) -> (i32, i32) {
    %c0_i32 = arith.constant 0 : i32
    %c0_i32_0 = arith.constant 0 : i32
    return %c0_i32, %arg1 : i32, i32
  }
  func.func @transform_3(%arg0: i32, %arg1: i32) -> (i32, i32) {
    %c0_i32 = arith.constant 0 : i32
    return %arg0, %arg1 : i32, i32
  }
}

module attributes {stable_mosaic.version = 11 : i64} {
  func.func @_gru_chunk_kernel(%arg0: i32, %arg1: i32, %arg2: memref<8x8x96xbf16, #tpu.memory_space<vmem>>, %arg3: memref<32x96xbf16, #tpu.memory_space<any>>, %arg4: memref<1x32xf32, #tpu.memory_space<vmem>>, %arg5: memref<8x32xf32, #tpu.memory_space<vmem>>, %arg6: memref<8x8x32xbf16, #tpu.memory_space<vmem>>, %arg7: memref<8x32xf32, #tpu.memory_space<vmem>>, %arg8: memref<32x96xbf16, #tpu.memory_space<vmem>>, %arg9: memref<!tpu.dma_semaphore, #tpu.memory_space<semaphore_mem>>, %arg10: memref<8x32xf32, #tpu.memory_space<vmem>>) attributes {dimension_semantics = [#tpu.dimension_semantics<parallel>, #tpu.dimension_semantics<arbitrary>], iteration_bounds = array<i64: 1, 1>, scalar_prefetch = 0 : i64, scratch_operands = 3 : i64, tpu.core_type = #tpu.core_type<tc>, window_params = [{transform_indices = @transform_0, window_bounds = array<i64: 8, 8, 96>}, {}, {pipeline_mode = #tpu.pipeline_mode<synchronous>, transform_indices = @transform_2, window_bounds = array<i64: 1, 32>}, {transform_indices = @transform_3, window_bounds = array<i64: 8, 32>}, {transform_indices = @transform_4, window_bounds = array<i64: 8, 8, 32>}, {transform_indices = @transform_5, window_bounds = array<i64: 8, 32>}]} {
    %c0_i32 = arith.constant 0 : i32
    %0 = arith.cmpi eq, %arg1, %c0_i32 : i32
    %1 = arith.extui %0 : i1 to i32
    %c0_i32_0 = arith.constant 0 : i32
    %2 = arith.cmpi ne, %1, %c0_i32_0 : i32
    scf.if %2 {
      tpu.enqueue_dma source(%arg3 : memref<32x96xbf16, #tpu.memory_space<any>>) target(%arg8 : memref<32x96xbf16, #tpu.memory_space<vmem>>) target_semaphore(%arg9 : memref<!tpu.dma_semaphore, #tpu.memory_space<semaphore_mem>>)
      tpu.wait_dma2 semaphore(%arg9 : memref<!tpu.dma_semaphore, #tpu.memory_space<semaphore_mem>>) src(%arg3 : memref<32x96xbf16, #tpu.memory_space<any>>) dst(%arg8 : memref<32x96xbf16, #tpu.memory_space<vmem>>)
      %c0_82 = arith.constant 0 : index
      %c0_83 = arith.constant 0 : index
      %298 = vector.load %arg5[%c0_82, %c0_83] : memref<8x32xf32, #tpu.memory_space<vmem>>, vector<8x32xf32>
      %c0_84 = arith.constant 0 : index
      %c0_85 = arith.constant 0 : index
      %299 = vector.load %arg10[%c0_84, %c0_85] : memref<8x32xf32, #tpu.memory_space<vmem>>, vector<8x32xf32>
      tpu.vector_store %arg10[%c0_84, %c0_85], %298 {strides = array<i32>} : memref<8x32xf32, #tpu.memory_space<vmem>>, vector<8x32xf32>,
    } else {
    }
    %c0 = arith.constant 0 : index
    %c0_1 = arith.constant 0 : index
    %3 = vector.load %arg10[%c0, %c0_1] : memref<8x32xf32, #tpu.memory_space<vmem>>, vector<8x32xf32>
    %c0_2 = arith.constant 0 : index
    %c0_3 = arith.constant 0 : index
    %4 = vector.load %arg8[%c0_2, %c0_3] : memref<32x96xbf16, #tpu.memory_space<vmem>>, vector<32x96xbf16>
    %c0_4 = arith.constant 0 : index
    %c0_5 = arith.constant 0 : index
    %5 = vector.load %arg4[%c0_4, %c0_5] : memref<1x32xf32, #tpu.memory_space<vmem>>, vector<1x32xf32>
    %6 = vector.shape_cast %5 : vector<1x32xf32> to vector<1x32xf32>
    %7 = vector.broadcast %6 : vector<1x32xf32> to vector<8x32xf32>
    %c0_6 = arith.constant 0 : index
    %c0_7 = arith.constant 0 : index
    %c0_8 = arith.constant 0 : index
    %8 = vector.load %arg2[%c0_6, %c0_7, %c0_8] : memref<8x8x96xbf16, #tpu.memory_space<vmem>>, vector<1x8x96xbf16>
    %9 = vector.shape_cast %8 : vector<1x8x96xbf16> to vector<8x96xbf16>
    %10 = arith.extf %9 : vector<8x96xbf16> to vector<8x96xf32>
    %11 = arith.truncf %3 : vector<8x32xf32> to vector<8x32xbf16>
    %cst = arith.constant dense<0.000000e+00> : vector<8x96xf32>
    %12 = tpu.matmul %11, %4, %cst {dimension_numbers = #tpu.dot_dimension_numbers<[1], [0], [0], [1], [0, 0, 1, 1], [], []>} : vector<8x32xbf16>, vector<32x96xbf16>, vector<8x96xf32> -> vector<8x96xf32>
    %13 = vector.extract_strided_slice %10 {offsets = [0, 0], sizes = [8, 32], strides = [1, 1]} : vector<8x96xf32> to vector<8x32xf32>
    %14 = vector.extract_strided_slice %12 {offsets = [0, 0], sizes = [8, 32], strides = [1, 1]} : vector<8x96xf32> to vector<8x32xf32>
    %15 = arith.addf %13, %14 : vector<8x32xf32>
    %16 = arith.negf %15 : vector<8x32xf32>
    %17 = math.exp %16 : vector<8x32xf32>
    %cst_9 = arith.constant 1.000000e+00 : f32
    %18 = vector.broadcast %cst_9 : f32 to vector<8x32xf32>
    %19 = arith.addf %18, %17 : vector<8x32xf32>
    %20 = arith.divf %18, %19 : vector<8x32xf32>
    %21 = vector.extract_strided_slice %10 {offsets = [0, 32], sizes = [8, 32], strides = [1, 1]} : vector<8x96xf32> to vector<8x32xf32>
    %22 = vector.extract_strided_slice %12 {offsets = [0, 32], sizes = [8, 32], strides = [1, 1]} : vector<8x96xf32> to vector<8x32xf32>
    %23 = arith.addf %21, %22 : vector<8x32xf32>
    %24 = arith.negf %23 : vector<8x32xf32>
    %25 = math.exp %24 : vector<8x32xf32>
    %cst_10 = arith.constant 1.000000e+00 : f32
    %26 = vector.broadcast %cst_10 : f32 to vector<8x32xf32>
    %27 = arith.addf %26, %25 : vector<8x32xf32>
    %28 = arith.divf %26, %27 : vector<8x32xf32>
    %29 = vector.extract_strided_slice %10 {offsets = [0, 64], sizes = [8, 32], strides = [1, 1]} : vector<8x96xf32> to vector<8x32xf32>
    %30 = vector.extract_strided_slice %12 {offsets = [0, 64], sizes = [8, 32], strides = [1, 1]} : vector<8x96xf32> to vector<8x32xf32>
    %31 = arith.addf %30, %7 : vector<8x32xf32>
    %32 = arith.mulf %20, %31 : vector<8x32xf32>
    %33 = arith.addf %29, %32 : vector<8x32xf32>
    %34 = math.tanh %33 : vector<8x32xf32>
    %cst_11 = arith.constant 1.000000e+00 : f32
    %35 = vector.broadcast %cst_11 : f32 to vector<8x32xf32>
    %36 = arith.subf %35, %28 : vector<8x32xf32>
    %37 = arith.mulf %36, %34 : vector<8x32xf32>
    %38 = arith.mulf %28, %3 : vector<8x32xf32>
    %39 = arith.addf %37, %38 : vector<8x32xf32>
    %40 = arith.truncf %39 : vector<8x32xf32> to vector<8x32xbf16>
    %c0_12 = arith.constant 0 : index
    %c0_13 = arith.constant 0 : index
    %c0_14 = arith.constant 0 : index
    %41 = vector.load %arg6[%c0_12, %c0_13, %c0_14] : memref<8x8x32xbf16, #tpu.memory_space<vmem>>, vector<1x8x32xbf16>
    %42 = vector.shape_cast %41 : vector<1x8x32xbf16> to vector<8x32xbf16>
    %43 = vector.shape_cast %40 : vector<8x32xbf16> to vector<1x8x32xbf16>
    tpu.vector_store %arg6[%c0_12, %c0_13, %c0_14], %43 {strides = array<i32>} : memref<8x8x32xbf16, #tpu.memory_space<vmem>>, vector<1x8x32xbf16>,
    %c1 = arith.constant 1 : index
    %c0_15 = arith.constant 0 : index
    %c0_16 = arith.constant 0 : index
    %44 = vector.load %arg2[%c1, %c0_15, %c0_16] : memref<8x8x96xbf16, #tpu.memory_space<vmem>>, vector<1x8x96xbf16>
    %45 = vector.shape_cast %44 : vector<1x8x96xbf16> to vector<8x96xbf16>
    %46 = arith.extf %45 : vector<8x96xbf16> to vector<8x96xf32>
    %47 = arith.truncf %39 : vector<8x32xf32> to vector<8x32xbf16>
    %cst_17 = arith.constant dense<0.000000e+00> : vector<8x96xf32>
    %48 = tpu.matmul %47, %4, %cst_17 {dimension_numbers = #tpu.dot_dimension_numbers<[1], [0], [0], [1], [0, 0, 1, 1], [], []>} : vector<8x32xbf16>, vector<32x96xbf16>, vector<8x96xf32> -> vector<8x96xf32>
    %49 = vector.extract_strided_slice %46 {offsets = [0, 0], sizes = [8, 32], strides = [1, 1]} : vector<8x96xf32> to vector<8x32xf32>
    %50 = vector.extract_strided_slice %48 {offsets = [0, 0], sizes = [8, 32], strides = [1, 1]} : vector<8x96xf32> to vector<8x32xf32>
    %51 = arith.addf %49, %50 : vector<8x32xf32>
    %52 = arith.negf %51 : vector<8x32xf32>
    %53 = math.exp %52 : vector<8x32xf32>
    %cst_18 = arith.constant 1.000000e+00 : f32
    %54 = vector.broadcast %cst_18 : f32 to vector<8x32xf32>
    %55 = arith.addf %54, %53 : vector<8x32xf32>
    %56 = arith.divf %54, %55 : vector<8x32xf32>
    %57 = vector.extract_strided_slice %46 {offsets = [0, 32], sizes = [8, 32], strides = [1, 1]} : vector<8x96xf32> to vector<8x32xf32>
    %58 = vector.extract_strided_slice %48 {offsets = [0, 32], sizes = [8, 32], strides = [1, 1]} : vector<8x96xf32> to vector<8x32xf32>
    %59 = arith.addf %57, %58 : vector<8x32xf32>
    %60 = arith.negf %59 : vector<8x32xf32>
    %61 = math.exp %60 : vector<8x32xf32>
    %cst_19 = arith.constant 1.000000e+00 : f32
    %62 = vector.broadcast %cst_19 : f32 to vector<8x32xf32>
    %63 = arith.addf %62, %61 : vector<8x32xf32>
    %64 = arith.divf %62, %63 : vector<8x32xf32>
    %65 = vector.extract_strided_slice %46 {offsets = [0, 64], sizes = [8, 32], strides = [1, 1]} : vector<8x96xf32> to vector<8x32xf32>
    %66 = vector.extract_strided_slice %48 {offsets = [0, 64], sizes = [8, 32], strides = [1, 1]} : vector<8x96xf32> to vector<8x32xf32>
    %67 = arith.addf %66, %7 : vector<8x32xf32>
    %68 = arith.mulf %56, %67 : vector<8x32xf32>
    %69 = arith.addf %65, %68 : vector<8x32xf32>
    %70 = math.tanh %69 : vector<8x32xf32>
    %cst_20 = arith.constant 1.000000e+00 : f32
    %71 = vector.broadcast %cst_20 : f32 to vector<8x32xf32>
    %72 = arith.subf %71, %64 : vector<8x32xf32>
    %73 = arith.mulf %72, %70 : vector<8x32xf32>
    %74 = arith.mulf %64, %39 : vector<8x32xf32>
    %75 = arith.addf %73, %74 : vector<8x32xf32>
    %76 = arith.truncf %75 : vector<8x32xf32> to vector<8x32xbf16>
    %c1_21 = arith.constant 1 : index
    %c0_22 = arith.constant 0 : index
    %c0_23 = arith.constant 0 : index
    %77 = vector.load %arg6[%c1_21, %c0_22, %c0_23] : memref<8x8x32xbf16, #tpu.memory_space<vmem>>, vector<1x8x32xbf16>
    %78 = vector.shape_cast %77 : vector<1x8x32xbf16> to vector<8x32xbf16>
    %79 = vector.shape_cast %76 : vector<8x32xbf16> to vector<1x8x32xbf16>
    tpu.vector_store %arg6[%c1_21, %c0_22, %c0_23], %79 {strides = array<i32>} : memref<8x8x32xbf16, #tpu.memory_space<vmem>>, vector<1x8x32xbf16>,
    %c2 = arith.constant 2 : index
    %c0_24 = arith.constant 0 : index
    %c0_25 = arith.constant 0 : index
    %80 = vector.load %arg2[%c2, %c0_24, %c0_25] : memref<8x8x96xbf16, #tpu.memory_space<vmem>>, vector<1x8x96xbf16>
    %81 = vector.shape_cast %80 : vector<1x8x96xbf16> to vector<8x96xbf16>
    %82 = arith.extf %81 : vector<8x96xbf16> to vector<8x96xf32>
    %83 = arith.truncf %75 : vector<8x32xf32> to vector<8x32xbf16>
    %cst_26 = arith.constant dense<0.000000e+00> : vector<8x96xf32>
    %84 = tpu.matmul %83, %4, %cst_26 {dimension_numbers = #tpu.dot_dimension_numbers<[1], [0], [0], [1], [0, 0, 1, 1], [], []>} : vector<8x32xbf16>, vector<32x96xbf16>, vector<8x96xf32> -> vector<8x96xf32>
    %85 = vector.extract_strided_slice %82 {offsets = [0, 0], sizes = [8, 32], strides = [1, 1]} : vector<8x96xf32> to vector<8x32xf32>
    %86 = vector.extract_strided_slice %84 {offsets = [0, 0], sizes = [8, 32], strides = [1, 1]} : vector<8x96xf32> to vector<8x32xf32>
    %87 = arith.addf %85, %86 : vector<8x32xf32>
    %88 = arith.negf %87 : vector<8x32xf32>
    %89 = math.exp %88 : vector<8x32xf32>
    %cst_27 = arith.constant 1.000000e+00 : f32
    %90 = vector.broadcast %cst_27 : f32 to vector<8x32xf32>
    %91 = arith.addf %90, %89 : vector<8x32xf32>
    %92 = arith.divf %90, %91 : vector<8x32xf32>
    %93 = vector.extract_strided_slice %82 {offsets = [0, 32], sizes = [8, 32], strides = [1, 1]} : vector<8x96xf32> to vector<8x32xf32>
    %94 = vector.extract_strided_slice %84 {offsets = [0, 32], sizes = [8, 32], strides = [1, 1]} : vector<8x96xf32> to vector<8x32xf32>
    %95 = arith.addf %93, %94 : vector<8x32xf32>
    %96 = arith.negf %95 : vector<8x32xf32>
    %97 = math.exp %96 : vector<8x32xf32>
    %cst_28 = arith.constant 1.000000e+00 : f32
    %98 = vector.broadcast %cst_28 : f32 to vector<8x32xf32>
    %99 = arith.addf %98, %97 : vector<8x32xf32>
    %100 = arith.divf %98, %99 : vector<8x32xf32>
    %101 = vector.extract_strided_slice %82 {offsets = [0, 64], sizes = [8, 32], strides = [1, 1]} : vector<8x96xf32> to vector<8x32xf32>
    %102 = vector.extract_strided_slice %84 {offsets = [0, 64], sizes = [8, 32], strides = [1, 1]} : vector<8x96xf32> to vector<8x32xf32>
    %103 = arith.addf %102, %7 : vector<8x32xf32>
    %104 = arith.mulf %92, %103 : vector<8x32xf32>
    %105 = arith.addf %101, %104 : vector<8x32xf32>
    %106 = math.tanh %105 : vector<8x32xf32>
    %cst_29 = arith.constant 1.000000e+00 : f32
    %107 = vector.broadcast %cst_29 : f32 to vector<8x32xf32>
    %108 = arith.subf %107, %100 : vector<8x32xf32>
    %109 = arith.mulf %108, %106 : vector<8x32xf32>
    %110 = arith.mulf %100, %75 : vector<8x32xf32>
    %111 = arith.addf %109, %110 : vector<8x32xf32>
    %112 = arith.truncf %111 : vector<8x32xf32> to vector<8x32xbf16>
    %c2_30 = arith.constant 2 : index
    %c0_31 = arith.constant 0 : index
    %c0_32 = arith.constant 0 : index
    %113 = vector.load %arg6[%c2_30, %c0_31, %c0_32] : memref<8x8x32xbf16, #tpu.memory_space<vmem>>, vector<1x8x32xbf16>
    %114 = vector.shape_cast %113 : vector<1x8x32xbf16> to vector<8x32xbf16>
    %115 = vector.shape_cast %112 : vector<8x32xbf16> to vector<1x8x32xbf16>
    tpu.vector_store %arg6[%c2_30, %c0_31, %c0_32], %115 {strides = array<i32>} : memref<8x8x32xbf16, #tpu.memory_space<vmem>>, vector<1x8x32xbf16>,
    %c3 = arith.constant 3 : index
    %c0_33 = arith.constant 0 : index
    %c0_34 = arith.constant 0 : index
    %116 = vector.load %arg2[%c3, %c0_33, %c0_34] : memref<8x8x96xbf16, #tpu.memory_space<vmem>>, vector<1x8x96xbf16>
    %117 = vector.shape_cast %116 : vector<1x8x96xbf16> to vector<8x96xbf16>
    %118 = arith.extf %117 : vector<8x96xbf16> to vector<8x96xf32>
    %119 = arith.truncf %111 : vector<8x32xf32> to vector<8x32xbf16>
    %cst_35 = arith.constant dense<0.000000e+00> : vector<8x96xf32>
    %120 = tpu.matmul %119, %4, %cst_35 {dimension_numbers = #tpu.dot_dimension_numbers<[1], [0], [0], [1], [0, 0, 1, 1], [], []>} : vector<8x32xbf16>, vector<32x96xbf16>, vector<8x96xf32> -> vector<8x96xf32>
    %121 = vector.extract_strided_slice %118 {offsets = [0, 0], sizes = [8, 32], strides = [1, 1]} : vector<8x96xf32> to vector<8x32xf32>
    %122 = vector.extract_strided_slice %120 {offsets = [0, 0], sizes = [8, 32], strides = [1, 1]} : vector<8x96xf32> to vector<8x32xf32>
    %123 = arith.addf %121, %122 : vector<8x32xf32>
    %124 = arith.negf %123 : vector<8x32xf32>
    %125 = math.exp %124 : vector<8x32xf32>
    %cst_36 = arith.constant 1.000000e+00 : f32
    %126 = vector.broadcast %cst_36 : f32 to vector<8x32xf32>
    %127 = arith.addf %126, %125 : vector<8x32xf32>
    %128 = arith.divf %126, %127 : vector<8x32xf32>
    %129 = vector.extract_strided_slice %118 {offsets = [0, 32], sizes = [8, 32], strides = [1, 1]} : vector<8x96xf32> to vector<8x32xf32>
    %130 = vector.extract_strided_slice %120 {offsets = [0, 32], sizes = [8, 32], strides = [1, 1]} : vector<8x96xf32> to vector<8x32xf32>
    %131 = arith.addf %129, %130 : vector<8x32xf32>
    %132 = arith.negf %131 : vector<8x32xf32>
    %133 = math.exp %132 : vector<8x32xf32>
    %cst_37 = arith.constant 1.000000e+00 : f32
    %134 = vector.broadcast %cst_37 : f32 to vector<8x32xf32>
    %135 = arith.addf %134, %133 : vector<8x32xf32>
    %136 = arith.divf %134, %135 : vector<8x32xf32>
    %137 = vector.extract_strided_slice %118 {offsets = [0, 64], sizes = [8, 32], strides = [1, 1]} : vector<8x96xf32> to vector<8x32xf32>
    %138 = vector.extract_strided_slice %120 {offsets = [0, 64], sizes = [8, 32], strides = [1, 1]} : vector<8x96xf32> to vector<8x32xf32>
    %139 = arith.addf %138, %7 : vector<8x32xf32>
    %140 = arith.mulf %128, %139 : vector<8x32xf32>
    %141 = arith.addf %137, %140 : vector<8x32xf32>
    %142 = math.tanh %141 : vector<8x32xf32>
    %cst_38 = arith.constant 1.000000e+00 : f32
    %143 = vector.broadcast %cst_38 : f32 to vector<8x32xf32>
    %144 = arith.subf %143, %136 : vector<8x32xf32>
    %145 = arith.mulf %144, %142 : vector<8x32xf32>
    %146 = arith.mulf %136, %111 : vector<8x32xf32>
    %147 = arith.addf %145, %146 : vector<8x32xf32>
    %148 = arith.truncf %147 : vector<8x32xf32> to vector<8x32xbf16>
    %c3_39 = arith.constant 3 : index
    %c0_40 = arith.constant 0 : index
    %c0_41 = arith.constant 0 : index
    %149 = vector.load %arg6[%c3_39, %c0_40, %c0_41] : memref<8x8x32xbf16, #tpu.memory_space<vmem>>, vector<1x8x32xbf16>
    %150 = vector.shape_cast %149 : vector<1x8x32xbf16> to vector<8x32xbf16>
    %151 = vector.shape_cast %148 : vector<8x32xbf16> to vector<1x8x32xbf16>
    tpu.vector_store %arg6[%c3_39, %c0_40, %c0_41], %151 {strides = array<i32>} : memref<8x8x32xbf16, #tpu.memory_space<vmem>>, vector<1x8x32xbf16>,
    %c4 = arith.constant 4 : index
    %c0_42 = arith.constant 0 : index
    %c0_43 = arith.constant 0 : index
    %152 = vector.load %arg2[%c4, %c0_42, %c0_43] : memref<8x8x96xbf16, #tpu.memory_space<vmem>>, vector<1x8x96xbf16>
    %153 = vector.shape_cast %152 : vector<1x8x96xbf16> to vector<8x96xbf16>
    %154 = arith.extf %153 : vector<8x96xbf16> to vector<8x96xf32>
    %155 = arith.truncf %147 : vector<8x32xf32> to vector<8x32xbf16>
    %cst_44 = arith.constant dense<0.000000e+00> : vector<8x96xf32>
    %156 = tpu.matmul %155, %4, %cst_44 {dimension_numbers = #tpu.dot_dimension_numbers<[1], [0], [0], [1], [0, 0, 1, 1], [], []>} : vector<8x32xbf16>, vector<32x96xbf16>, vector<8x96xf32> -> vector<8x96xf32>
    %157 = vector.extract_strided_slice %154 {offsets = [0, 0], sizes = [8, 32], strides = [1, 1]} : vector<8x96xf32> to vector<8x32xf32>
    %158 = vector.extract_strided_slice %156 {offsets = [0, 0], sizes = [8, 32], strides = [1, 1]} : vector<8x96xf32> to vector<8x32xf32>
    %159 = arith.addf %157, %158 : vector<8x32xf32>
    %160 = arith.negf %159 : vector<8x32xf32>
    %161 = math.exp %160 : vector<8x32xf32>
    %cst_45 = arith.constant 1.000000e+00 : f32
    %162 = vector.broadcast %cst_45 : f32 to vector<8x32xf32>
    %163 = arith.addf %162, %161 : vector<8x32xf32>
    %164 = arith.divf %162, %163 : vector<8x32xf32>
    %165 = vector.extract_strided_slice %154 {offsets = [0, 32], sizes = [8, 32], strides = [1, 1]} : vector<8x96xf32> to vector<8x32xf32>
    %166 = vector.extract_strided_slice %156 {offsets = [0, 32], sizes = [8, 32], strides = [1, 1]} : vector<8x96xf32> to vector<8x32xf32>
    %167 = arith.addf %165, %166 : vector<8x32xf32>
    %168 = arith.negf %167 : vector<8x32xf32>
    %169 = math.exp %168 : vector<8x32xf32>
    %cst_46 = arith.constant 1.000000e+00 : f32
    %170 = vector.broadcast %cst_46 : f32 to vector<8x32xf32>
    %171 = arith.addf %170, %169 : vector<8x32xf32>
    %172 = arith.divf %170, %171 : vector<8x32xf32>
    %173 = vector.extract_strided_slice %154 {offsets = [0, 64], sizes = [8, 32], strides = [1, 1]} : vector<8x96xf32> to vector<8x32xf32>
    %174 = vector.extract_strided_slice %156 {offsets = [0, 64], sizes = [8, 32], strides = [1, 1]} : vector<8x96xf32> to vector<8x32xf32>
    %175 = arith.addf %174, %7 : vector<8x32xf32>
    %176 = arith.mulf %164, %175 : vector<8x32xf32>
    %177 = arith.addf %173, %176 : vector<8x32xf32>
    %178 = math.tanh %177 : vector<8x32xf32>
    %cst_47 = arith.constant 1.000000e+00 : f32
    %179 = vector.broadcast %cst_47 : f32 to vector<8x32xf32>
    %180 = arith.subf %179, %172 : vector<8x32xf32>
    %181 = arith.mulf %180, %178 : vector<8x32xf32>
    %182 = arith.mulf %172, %147 : vector<8x32xf32>
    %183 = arith.addf %181, %182 : vector<8x32xf32>
    %184 = arith.truncf %183 : vector<8x32xf32> to vector<8x32xbf16>
    %c4_48 = arith.constant 4 : index
    %c0_49 = arith.constant 0 : index
    %c0_50 = arith.constant 0 : index
    %185 = vector.load %arg6[%c4_48, %c0_49, %c0_50] : memref<8x8x32xbf16, #tpu.memory_space<vmem>>, vector<1x8x32xbf16>
    %186 = vector.shape_cast %185 : vector<1x8x32xbf16> to vector<8x32xbf16>
    %187 = vector.shape_cast %184 : vector<8x32xbf16> to vector<1x8x32xbf16>
    tpu.vector_store %arg6[%c4_48, %c0_49, %c0_50], %187 {strides = array<i32>} : memref<8x8x32xbf16, #tpu.memory_space<vmem>>, vector<1x8x32xbf16>,
    %c5 = arith.constant 5 : index
    %c0_51 = arith.constant 0 : index
    %c0_52 = arith.constant 0 : index
    %188 = vector.load %arg2[%c5, %c0_51, %c0_52] : memref<8x8x96xbf16, #tpu.memory_space<vmem>>, vector<1x8x96xbf16>
    %189 = vector.shape_cast %188 : vector<1x8x96xbf16> to vector<8x96xbf16>
    %190 = arith.extf %189 : vector<8x96xbf16> to vector<8x96xf32>
    %191 = arith.truncf %183 : vector<8x32xf32> to vector<8x32xbf16>
    %cst_53 = arith.constant dense<0.000000e+00> : vector<8x96xf32>
    %192 = tpu.matmul %191, %4, %cst_53 {dimension_numbers = #tpu.dot_dimension_numbers<[1], [0], [0], [1], [0, 0, 1, 1], [], []>} : vector<8x32xbf16>, vector<32x96xbf16>, vector<8x96xf32> -> vector<8x96xf32>
    %193 = vector.extract_strided_slice %190 {offsets = [0, 0], sizes = [8, 32], strides = [1, 1]} : vector<8x96xf32> to vector<8x32xf32>
    %194 = vector.extract_strided_slice %192 {offsets = [0, 0], sizes = [8, 32], strides = [1, 1]} : vector<8x96xf32> to vector<8x32xf32>
    %195 = arith.addf %193, %194 : vector<8x32xf32>
    %196 = arith.negf %195 : vector<8x32xf32>
    %197 = math.exp %196 : vector<8x32xf32>
    %cst_54 = arith.constant 1.000000e+00 : f32
    %198 = vector.broadcast %cst_54 : f32 to vector<8x32xf32>
    %199 = arith.addf %198, %197 : vector<8x32xf32>
    %200 = arith.divf %198, %199 : vector<8x32xf32>
    %201 = vector.extract_strided_slice %190 {offsets = [0, 32], sizes = [8, 32], strides = [1, 1]} : vector<8x96xf32> to vector<8x32xf32>
    %202 = vector.extract_strided_slice %192 {offsets = [0, 32], sizes = [8, 32], strides = [1, 1]} : vector<8x96xf32> to vector<8x32xf32>
    %203 = arith.addf %201, %202 : vector<8x32xf32>
    %204 = arith.negf %203 : vector<8x32xf32>
    %205 = math.exp %204 : vector<8x32xf32>
    %cst_55 = arith.constant 1.000000e+00 : f32
    %206 = vector.broadcast %cst_55 : f32 to vector<8x32xf32>
    %207 = arith.addf %206, %205 : vector<8x32xf32>
    %208 = arith.divf %206, %207 : vector<8x32xf32>
    %209 = vector.extract_strided_slice %190 {offsets = [0, 64], sizes = [8, 32], strides = [1, 1]} : vector<8x96xf32> to vector<8x32xf32>
    %210 = vector.extract_strided_slice %192 {offsets = [0, 64], sizes = [8, 32], strides = [1, 1]} : vector<8x96xf32> to vector<8x32xf32>
    %211 = arith.addf %210, %7 : vector<8x32xf32>
    %212 = arith.mulf %200, %211 : vector<8x32xf32>
    %213 = arith.addf %209, %212 : vector<8x32xf32>
    %214 = math.tanh %213 : vector<8x32xf32>
    %cst_56 = arith.constant 1.000000e+00 : f32
    %215 = vector.broadcast %cst_56 : f32 to vector<8x32xf32>
    %216 = arith.subf %215, %208 : vector<8x32xf32>
    %217 = arith.mulf %216, %214 : vector<8x32xf32>
    %218 = arith.mulf %208, %183 : vector<8x32xf32>
    %219 = arith.addf %217, %218 : vector<8x32xf32>
    %220 = arith.truncf %219 : vector<8x32xf32> to vector<8x32xbf16>
    %c5_57 = arith.constant 5 : index
    %c0_58 = arith.constant 0 : index
    %c0_59 = arith.constant 0 : index
    %221 = vector.load %arg6[%c5_57, %c0_58, %c0_59] : memref<8x8x32xbf16, #tpu.memory_space<vmem>>, vector<1x8x32xbf16>
    %222 = vector.shape_cast %221 : vector<1x8x32xbf16> to vector<8x32xbf16>
    %223 = vector.shape_cast %220 : vector<8x32xbf16> to vector<1x8x32xbf16>
    tpu.vector_store %arg6[%c5_57, %c0_58, %c0_59], %223 {strides = array<i32>} : memref<8x8x32xbf16, #tpu.memory_space<vmem>>, vector<1x8x32xbf16>,
    %c6 = arith.constant 6 : index
    %c0_60 = arith.constant 0 : index
    %c0_61 = arith.constant 0 : index
    %224 = vector.load %arg2[%c6, %c0_60, %c0_61] : memref<8x8x96xbf16, #tpu.memory_space<vmem>>, vector<1x8x96xbf16>
    %225 = vector.shape_cast %224 : vector<1x8x96xbf16> to vector<8x96xbf16>
    %226 = arith.extf %225 : vector<8x96xbf16> to vector<8x96xf32>
    %227 = arith.truncf %219 : vector<8x32xf32> to vector<8x32xbf16>
    %cst_62 = arith.constant dense<0.000000e+00> : vector<8x96xf32>
    %228 = tpu.matmul %227, %4, %cst_62 {dimension_numbers = #tpu.dot_dimension_numbers<[1], [0], [0], [1], [0, 0, 1, 1], [], []>} : vector<8x32xbf16>, vector<32x96xbf16>, vector<8x96xf32> -> vector<8x96xf32>
    %229 = vector.extract_strided_slice %226 {offsets = [0, 0], sizes = [8, 32], strides = [1, 1]} : vector<8x96xf32> to vector<8x32xf32>
    %230 = vector.extract_strided_slice %228 {offsets = [0, 0], sizes = [8, 32], strides = [1, 1]} : vector<8x96xf32> to vector<8x32xf32>
    %231 = arith.addf %229, %230 : vector<8x32xf32>
    %232 = arith.negf %231 : vector<8x32xf32>
    %233 = math.exp %232 : vector<8x32xf32>
    %cst_63 = arith.constant 1.000000e+00 : f32
    %234 = vector.broadcast %cst_63 : f32 to vector<8x32xf32>
    %235 = arith.addf %234, %233 : vector<8x32xf32>
    %236 = arith.divf %234, %235 : vector<8x32xf32>
    %237 = vector.extract_strided_slice %226 {offsets = [0, 32], sizes = [8, 32], strides = [1, 1]} : vector<8x96xf32> to vector<8x32xf32>
    %238 = vector.extract_strided_slice %228 {offsets = [0, 32], sizes = [8, 32], strides = [1, 1]} : vector<8x96xf32> to vector<8x32xf32>
    %239 = arith.addf %237, %238 : vector<8x32xf32>
    %240 = arith.negf %239 : vector<8x32xf32>
    %241 = math.exp %240 : vector<8x32xf32>
    %cst_64 = arith.constant 1.000000e+00 : f32
    %242 = vector.broadcast %cst_64 : f32 to vector<8x32xf32>
    %243 = arith.addf %242, %241 : vector<8x32xf32>
    %244 = arith.divf %242, %243 : vector<8x32xf32>
    %245 = vector.extract_strided_slice %226 {offsets = [0, 64], sizes = [8, 32], strides = [1, 1]} : vector<8x96xf32> to vector<8x32xf32>
    %246 = vector.extract_strided_slice %228 {offsets = [0, 64], sizes = [8, 32], strides = [1, 1]} : vector<8x96xf32> to vector<8x32xf32>
    %247 = arith.addf %246, %7 : vector<8x32xf32>
    %248 = arith.mulf %236, %247 : vector<8x32xf32>
    %249 = arith.addf %245, %248 : vector<8x32xf32>
    %250 = math.tanh %249 : vector<8x32xf32>
    %cst_65 = arith.constant 1.000000e+00 : f32
    %251 = vector.broadcast %cst_65 : f32 to vector<8x32xf32>
    %252 = arith.subf %251, %244 : vector<8x32xf32>
    %253 = arith.mulf %252, %250 : vector<8x32xf32>
    %254 = arith.mulf %244, %219 : vector<8x32xf32>
    %255 = arith.addf %253, %254 : vector<8x32xf32>
    %256 = arith.truncf %255 : vector<8x32xf32> to vector<8x32xbf16>
    %c6_66 = arith.constant 6 : index
    %c0_67 = arith.constant 0 : index
    %c0_68 = arith.constant 0 : index
    %257 = vector.load %arg6[%c6_66, %c0_67, %c0_68] : memref<8x8x32xbf16, #tpu.memory_space<vmem>>, vector<1x8x32xbf16>
    %258 = vector.shape_cast %257 : vector<1x8x32xbf16> to vector<8x32xbf16>
    %259 = vector.shape_cast %256 : vector<8x32xbf16> to vector<1x8x32xbf16>
    tpu.vector_store %arg6[%c6_66, %c0_67, %c0_68], %259 {strides = array<i32>} : memref<8x8x32xbf16, #tpu.memory_space<vmem>>, vector<1x8x32xbf16>,
    %c7 = arith.constant 7 : index
    %c0_69 = arith.constant 0 : index
    %c0_70 = arith.constant 0 : index
    %260 = vector.load %arg2[%c7, %c0_69, %c0_70] : memref<8x8x96xbf16, #tpu.memory_space<vmem>>, vector<1x8x96xbf16>
    %261 = vector.shape_cast %260 : vector<1x8x96xbf16> to vector<8x96xbf16>
    %262 = arith.extf %261 : vector<8x96xbf16> to vector<8x96xf32>
    %263 = arith.truncf %255 : vector<8x32xf32> to vector<8x32xbf16>
    %cst_71 = arith.constant dense<0.000000e+00> : vector<8x96xf32>
    %264 = tpu.matmul %263, %4, %cst_71 {dimension_numbers = #tpu.dot_dimension_numbers<[1], [0], [0], [1], [0, 0, 1, 1], [], []>} : vector<8x32xbf16>, vector<32x96xbf16>, vector<8x96xf32> -> vector<8x96xf32>
    %265 = vector.extract_strided_slice %262 {offsets = [0, 0], sizes = [8, 32], strides = [1, 1]} : vector<8x96xf32> to vector<8x32xf32>
    %266 = vector.extract_strided_slice %264 {offsets = [0, 0], sizes = [8, 32], strides = [1, 1]} : vector<8x96xf32> to vector<8x32xf32>
    %267 = arith.addf %265, %266 : vector<8x32xf32>
    %268 = arith.negf %267 : vector<8x32xf32>
    %269 = math.exp %268 : vector<8x32xf32>
    %cst_72 = arith.constant 1.000000e+00 : f32
    %270 = vector.broadcast %cst_72 : f32 to vector<8x32xf32>
    %271 = arith.addf %270, %269 : vector<8x32xf32>
    %272 = arith.divf %270, %271 : vector<8x32xf32>
    %273 = vector.extract_strided_slice %262 {offsets = [0, 32], sizes = [8, 32], strides = [1, 1]} : vector<8x96xf32> to vector<8x32xf32>
    %274 = vector.extract_strided_slice %264 {offsets = [0, 32], sizes = [8, 32], strides = [1, 1]} : vector<8x96xf32> to vector<8x32xf32>
    %275 = arith.addf %273, %274 : vector<8x32xf32>
    %276 = arith.negf %275 : vector<8x32xf32>
    %277 = math.exp %276 : vector<8x32xf32>
    %cst_73 = arith.constant 1.000000e+00 : f32
    %278 = vector.broadcast %cst_73 : f32 to vector<8x32xf32>
    %279 = arith.addf %278, %277 : vector<8x32xf32>
    %280 = arith.divf %278, %279 : vector<8x32xf32>
    %281 = vector.extract_strided_slice %262 {offsets = [0, 64], sizes = [8, 32], strides = [1, 1]} : vector<8x96xf32> to vector<8x32xf32>
    %282 = vector.extract_strided_slice %264 {offsets = [0, 64], sizes = [8, 32], strides = [1, 1]} : vector<8x96xf32> to vector<8x32xf32>
    %283 = arith.addf %282, %7 : vector<8x32xf32>
    %284 = arith.mulf %272, %283 : vector<8x32xf32>
    %285 = arith.addf %281, %284 : vector<8x32xf32>
    %286 = math.tanh %285 : vector<8x32xf32>
    %cst_74 = arith.constant 1.000000e+00 : f32
    %287 = vector.broadcast %cst_74 : f32 to vector<8x32xf32>
    %288 = arith.subf %287, %280 : vector<8x32xf32>
    %289 = arith.mulf %288, %286 : vector<8x32xf32>
    %290 = arith.mulf %280, %255 : vector<8x32xf32>
    %291 = arith.addf %289, %290 : vector<8x32xf32>
    %292 = arith.truncf %291 : vector<8x32xf32> to vector<8x32xbf16>
    %c7_75 = arith.constant 7 : index
    %c0_76 = arith.constant 0 : index
    %c0_77 = arith.constant 0 : index
    %293 = vector.load %arg6[%c7_75, %c0_76, %c0_77] : memref<8x8x32xbf16, #tpu.memory_space<vmem>>, vector<1x8x32xbf16>
    %294 = vector.shape_cast %293 : vector<1x8x32xbf16> to vector<8x32xbf16>
    %295 = vector.shape_cast %292 : vector<8x32xbf16> to vector<1x8x32xbf16>
    tpu.vector_store %arg6[%c7_75, %c0_76, %c0_77], %295 {strides = array<i32>} : memref<8x8x32xbf16, #tpu.memory_space<vmem>>, vector<1x8x32xbf16>,
    %c0_78 = arith.constant 0 : index
    %c0_79 = arith.constant 0 : index
    %296 = vector.load %arg10[%c0_78, %c0_79] : memref<8x32xf32, #tpu.memory_space<vmem>>, vector<8x32xf32>
    tpu.vector_store %arg10[%c0_78, %c0_79], %291 {strides = array<i32>} : memref<8x32xf32, #tpu.memory_space<vmem>>, vector<8x32xf32>,
    %c0_80 = arith.constant 0 : index
    %c0_81 = arith.constant 0 : index
    %297 = vector.load %arg7[%c0_80, %c0_81] : memref<8x32xf32, #tpu.memory_space<vmem>>, vector<8x32xf32>
    tpu.vector_store %arg7[%c0_80, %c0_81], %291 {strides = array<i32>} : memref<8x32xf32, #tpu.memory_space<vmem>>, vector<8x32xf32>,
    return
  }
  func.func @transform_0(%arg0: i32, %arg1: i32) -> (i32, i32, i32) {
    %c0_i32 = arith.constant 0 : i32
    %c0_i32_0 = arith.constant 0 : i32
    return %arg1, %arg0, %c0_i32 : i32, i32, i32
  }
  func.func @transform_2(%arg0: i32, %arg1: i32) -> (i32, i32) {
    %c0_i32 = arith.constant 0 : i32
    %c0_i32_0 = arith.constant 0 : i32
    %c0_i32_1 = arith.constant 0 : i32
    return %c0_i32, %c0_i32_0 : i32, i32
  }
  func.func @transform_3(%arg0: i32, %arg1: i32) -> (i32, i32) {
    %c0_i32 = arith.constant 0 : i32
    %c0_i32_0 = arith.constant 0 : i32
    return %arg0, %c0_i32 : i32, i32
  }
  func.func @transform_4(%arg0: i32, %arg1: i32) -> (i32, i32, i32) {
    %c0_i32 = arith.constant 0 : i32
    %c0_i32_0 = arith.constant 0 : i32
    return %arg1, %arg0, %c0_i32 : i32, i32, i32
  }
  func.func @transform_5(%arg0: i32, %arg1: i32) -> (i32, i32) {
    %c0_i32 = arith.constant 0 : i32
    %c0_i32_0 = arith.constant 0 : i32
    return %arg0, %c0_i32 : i32, i32
  }
}

module attributes {stable_mosaic.version = 11 : i64} {
  func.func @_matmul_bias_kernel(%arg0: i32, %arg1: i32, %arg2: memref<16x32xbf16, #tpu.memory_space<vmem>>, %arg3: memref<32x128xbf16, #tpu.memory_space<vmem>>, %arg4: memref<1x128xf32, #tpu.memory_space<vmem>>, %arg5: memref<16x128xbf16, #tpu.memory_space<vmem>>) attributes {dimension_semantics = [#tpu.dimension_semantics<parallel>, #tpu.dimension_semantics<parallel>], iteration_bounds = array<i64: 1, 1>, scalar_prefetch = 0 : i64, scratch_operands = 0 : i64, tpu.core_type = #tpu.core_type<tc>, window_params = [{transform_indices = @transform_0, window_bounds = array<i64: 16, 32>}, {transform_indices = @transform_1, window_bounds = array<i64: 32, 128>}, {transform_indices = @transform_2, window_bounds = array<i64: 1, 128>}, {transform_indices = @transform_3, window_bounds = array<i64: 16, 128>}]} {
    %c0 = arith.constant 0 : index
    %c0_0 = arith.constant 0 : index
    %0 = vector.load %arg2[%c0, %c0_0] : memref<16x32xbf16, #tpu.memory_space<vmem>>, vector<16x32xbf16>
    %c0_1 = arith.constant 0 : index
    %c0_2 = arith.constant 0 : index
    %1 = vector.load %arg3[%c0_1, %c0_2] : memref<32x128xbf16, #tpu.memory_space<vmem>>, vector<32x128xbf16>
    %cst = arith.constant dense<0.000000e+00> : vector<16x128xf32>
    %2 = tpu.matmul %0, %1, %cst {dimension_numbers = #tpu.dot_dimension_numbers<[1], [0], [0], [1], [0, 0, 1, 1], [], []>} : vector<16x32xbf16>, vector<32x128xbf16>, vector<16x128xf32> -> vector<16x128xf32>
    %c0_3 = arith.constant 0 : index
    %c0_4 = arith.constant 0 : index
    %3 = vector.load %arg4[%c0_3, %c0_4] : memref<1x128xf32, #tpu.memory_space<vmem>>, vector<1x128xf32>
    %4 = vector.broadcast %3 : vector<1x128xf32> to vector<16x128xf32>
    %5 = arith.addf %2, %4 : vector<16x128xf32>
    %6 = arith.truncf %5 : vector<16x128xf32> to vector<16x128xbf16>
    %c0_5 = arith.constant 0 : index
    %c0_6 = arith.constant 0 : index
    %7 = vector.load %arg5[%c0_5, %c0_6] : memref<16x128xbf16, #tpu.memory_space<vmem>>, vector<16x128xbf16>
    tpu.vector_store %arg5[%c0_5, %c0_6], %6 {strides = array<i32>} : memref<16x128xbf16, #tpu.memory_space<vmem>>, vector<16x128xbf16>,
    return
  }
  func.func @transform_0(%arg0: i32, %arg1: i32) -> (i32, i32) {
    %c0_i32 = arith.constant 0 : i32
    %c0_i32_0 = arith.constant 0 : i32
    return %arg0, %c0_i32 : i32, i32
  }
  func.func @transform_1(%arg0: i32, %arg1: i32) -> (i32, i32) {
    %c0_i32 = arith.constant 0 : i32
    %c0_i32_0 = arith.constant 0 : i32
    return %c0_i32, %arg1 : i32, i32
  }
  func.func @transform_2(%arg0: i32, %arg1: i32) -> (i32, i32) {
    %c0_i32 = arith.constant 0 : i32
    %c0_i32_0 = arith.constant 0 : i32
    return %c0_i32, %arg1 : i32, i32
  }
  func.func @transform_3(%arg0: i32, %arg1: i32) -> (i32, i32) {
    %c0_i32 = arith.constant 0 : i32
    return %arg0, %arg1 : i32, i32
  }
}

</mosaic_0001>

<bundles_post_ra>
// kernel: decoder_forward.5
= control target key start
LH: loop header
LB: loop body
LE: loop exit
PB: predicated region body
PF: predicated region fallthrough
CT: control target
= control target key end

     0   :  { %v134_v0 = vmov 0.0   ;;  %vm135_vm0 = vmmov 0   ;;  %vm45_vm1 = vcmask 261120   ;;  %s171_s1 = inlined_call_operand.vmem [shape: bf16[32,128], index: 1, kind: input, shape index: {}]   ;;  %s172_s0 = inlined_call_operand.vmem [shape: bf16[16,32], index: 0, kind: input, shape index: {}]   ;;  %s173_s2 = inlined_call_operand.vmem [shape: f32[1,128], index: 2, kind: input, shape index: {}]   ;;  %s174_s3 = inlined_call_operand.vmem [shape: bf16[16,128], index: 3, kind: output, shape index: {}]  }
   0x1   :  { %121 = vmatprep.subr.bf16.mxu0 %v134_v0  ;;  %v131_v1 = vld [vmem:[%s171_s1 + $0x8] sm:$0xff]   ;;  %125 = vmatprep.mubr.msk.bf16.mxu0 %vm135_vm0, %v134_v0  ;;  %v132_v2 = vld [vmem:[%s171_s1] sm:$0xff]  }
   0x2   :  { %122 = vmatpush3.bf16.msra.mxu0 %v131_v1  ;;  %v133_v3 = vld [vmem:[%s172_s0] sm:$0xff]  }
   0x3   :  { %123 = vmatprep.subr.bf16.mxu0 %v134_v0  ;;  %v104_v5 = vld [vmem:[%s173_s2] ss:$0 sm:$0xff] }
   0x6   :  { %124 = vmatpush3.bf16.msra.mxu0 %v132_v2 }
   0x9   :  { %126 = vmatmul.mubr.msk.bf16.vlgmr.msra.gmra.mxu0 %vm45_vm1, %v133_v3 }
  0xc9   :  { %v83_v4 = vpop.f32.mrf.mxu0 }
  0xca   :  { %v84_v8 = vadd.f32 %v104_v5, %v83_v4 }
  0xcb   :  { %v127_v6 = vpop.f32.mrf.mxu0 }
  0xcd   :  { %v86_v7 = vpop.f32.mrf.mxu0 }
  0xce   :  { %v87_v9 = vadd.f32 %v104_v5, %v86_v7 }
  0xcf   :  { %v128_v10 = vpop.f32.mrf.mxu0 }
  0xd0   :  { %v116_v11 = vpack.c.bf16 %v87_v9, %v84_v8 }
  0xd2   :  { %117 = vst [vmem:[%s174_s3] sm:$0xff] %v116_v11  }

// kernel: decoder_forward.3
= control target key start
LH: loop header
LB: loop body
LE: loop exit
PB: predicated region body
PF: predicated region fallthrough
CT: control target
= control target key end

     0   :  { %vm58_vm0 = vcmask 130048   ;;  %s301_s1 = inlined_call_operand.vmem [shape: bf16[16,128], index: 1, kind: input, shape index: {}]   ;;  %s302_s0 = inlined_call_operand.vmem [shape: bf16[64,16], index: 0, kind: input, shape index: {}]   ;;  %s303_s2 = inlined_call_operand.vmem [shape: f32[1,128], index: 2, kind: input, shape index: {}]   ;;  %s304_s3 = inlined_call_operand.vmem [shape: bf16[64,128], index: 3, kind: output, shape index: {}]  }
   0x1   :  { %v246_v0 = vld [vmem:[%s301_s1] sm:$0xff]   ;;  %v248_v2 = vld [vmem:[%s302_s0 + $0x10] sm:$0xff]   ;;  %v249_v3 = vld [vmem:[%s302_s0 + $0x8] sm:$0xff]  }
   0x2   :  { %v247_v1 = vld [vmem:[%s302_s0] sm:$0xff]   ;;  %234 = vmatprep.subr.bf16.mxu0 %v246_v0  ;;  %244 = vmatprep.subr.bf16.mxu1 %v246_v0  ;;  %v250_v4 = vld [vmem:[%s302_s0 + $0x18] sm:$0xff]  }
   0x3   :  { %235 = vmatpush3.bf16.msra.mxu0 %v246_v0  ;;  %245 = vmatpush3.bf16.msra.mxu1 %v246_v0  ;;  %v180_v7 = vld [vmem:[%s303_s2] ss:$0 sm:$0xff] }
   0x4   :  { %236 = vmatprep.mubr.msk.bf16.mxu0 %vm58_vm0, %v247_v1  ;;  %240 = vmatprep.mubr.msk.bf16.mxu1 %vm58_vm0, %v248_v2 }
   0x6   :  { %237 = vmatmul.mubr.msk.bf16.vlgmr.msra.gmra.mxu0 %vm58_vm0, %v249_v3  ;;  %241 = vmatmul.mubr.msk.bf16.vlgmr.msra.gmra.mxu1 %vm58_vm0, %v250_v4 }
  0xc6   :  { %v238_v5 = vpop.f32.mrf.mxu0  ;;  %v242_v6 = vpop.f32.mrf.mxu1 }
  0xc7   :  { %v114_v12 = vadd.f32 %v238_v5, %v180_v7  ;;  %v130_v13 = vadd.f32 %v242_v6, %v180_v7 }
  0xc8   :  { %v105_v8 = vpop.f32.mrf.mxu0  ;;  %v121_v9 = vpop.f32.mrf.mxu1 }
  0xc9   :  { %v106_v16 = vadd.f32 %v180_v7, %v105_v8  ;;  %v122_v17 = vadd.f32 %v180_v7, %v121_v9 }
  0xca   :  { %v239_v10 = vpop.f32.mrf.mxu0  ;;  %v243_v11 = vpop.f32.mrf.mxu1 }
  0xcb   :  { %v117_v14 = vadd.f32 %v239_v10, %v180_v7  ;;  %v133_v15 = vadd.f32 %v243_v11, %v180_v7 }
  0xcc   :  { %v108_v18 = vpop.f32.mrf.mxu0  ;;  %v124_v19 = vpop.f32.mrf.mxu1 }
  0xcd   :  { %v214_v20 = vpack.c.bf16 %v117_v14, %v114_v12  ;;  %v224_v21 = vpack.c.bf16 %v133_v15, %v130_v13  ;;  %v109_v22 = vadd.f32 %v180_v7, %v108_v18  ;;  %v125_v23 = vadd.f32 %v180_v7, %v124_v19 }
  0xcf   :  { %226 = vst [vmem:[%s304_s3 + $0x8] sm:$0xff] %v214_v20   ;;  %228 = vst [vmem:[%s304_s3 + $0x18] sm:$0xff] %v224_v21   ;;  %v209_v24 = vpack.c.bf16 %v109_v22, %v106_v16  ;;  %v219_v25 = vpack.c.bf16 %v125_v23, %v122_v17 }
  0xd1   :  { %210 = vst [vmem:[%s304_s3] sm:$0xff] %v209_v24   ;;  %227 = vst [vmem:[%s304_s3 + $0x10] sm:$0xff] %v219_v25  }

// kernel: decoder_forward.4
= control target key start
LH: loop header
LB: loop body
LE: loop exit
PB: predicated region body
PF: predicated region fallthrough
CT: control target
= control target key end

     0   :  { %s1230_s0 = inlined_call_operand.vmem [shape: bf16[8,8,96], index: 0, kind: input, shape index: {}]   ;;  %s1231_s1 = inlined_call_operand.vmem [shape: bf16[32,96], index: 1, kind: input, shape index: {}]   ;;  %s1232_s2 = inlined_call_operand.vmem [shape: f32[1,32], index: 2, kind: input, shape index: {}]   ;;  %s1233_s3 = inlined_call_operand.vmem [shape: f32[8,32], index: 3, kind: input, shape index: {}]   ;;  %s1234_s4 = inlined_call_operand.vmem [shape: bf16[8,8,32], index: 4, kind: output, shape index: {0}]   ;;  %s1235_s5 = inlined_call_operand.vmem [shape: f32[8,32], index: 5, kind: output, shape index: {1}]  }
   0x1   :  { %v55_v0 = vld [vmem:[%s1231_s1] sm:$0xff]  ;;  %v57_v1 = vld [vmem:[%s1231_s1 + $0x8] sm:$0xff] }
   0x2   :  { %56 = vst [vmem:[#allocation2] sm:$0xff] %v55_v0  ;;  %58 = vst [vmem:[#allocation2 + $0x8] sm:$0xff] %v57_v1 }
   0x3   :  { %66 = vsyncadd [#allocation3], 256 }
   0x4   :  { %996 = dma.done.wait [#allocation3], 256 }
   0x5   :  { %997 = vsyncadd [#allocation3], 4294967040  ;;  %v998_v2 = vmov 0.0   ;;  %vm999_vm0 = vmmov 0   ;;  %vm72_vm1 = vcmask 261120   ;;  %v71_v5 = vld [vmem:[%s1233_s3] sm:$0xff] }
   0x6   :  { %877 = vmatprep.subr.bf16.mxu0 %v998_v2  ;;  %881 = vmatprep.mubr.msk.bf16.mxu0 %vm999_vm0, %v998_v2  ;;  %v803_v6 = vld [vmem:[%s1232_s2] ss:$0 sm:$0xff]  ;;  %73 = vst.msk [vmem:[#allocation4] sm:$0xff] %vm72_vm1, %v71_v5  ;;  %s1000_s25 = smov 64   ;;  %s1001_s2 = smov 32   ;;  %v814_v63 = vld [vmem:[%s1230_s0 + $0x8] sm:$0xff]  }
   0x7   :  { %885 = vmatprep.subr.bf16.mxu1 %v998_v2  ;;  %889 = vmatprep.mubr.msk.bf16.mxu1 %vm999_vm0, %v998_v2  ;;  %v85_v15 = vld [vmem:[%s1230_s0] sm:$0xff]   ;;  %s1002_s27 = smov 96   ;;  %v273_v0 = vunpack.c.l.bf16 %v814_v63  ;;  %vm185_vm2 = vcmask 257024  }
   0x8   :  { %151 = vrot.lane.b32.xlu0 %v803_v6, %s1000_s25  ;;  %v86_v16 = vunpack.c.l.bf16 %v85_v15  ;;  %v189_v40 = vunpack.c.h.bf16 %v85_v15 }
   0x9   :  { %v1045_v3 = vld [vmem:[#allocation2 + $0x8] sm:$0xff]   ;;  %v1048_v4 = vld [vmem:[#allocation2] sm:$0xff]  }
   0xa   :  { %878 = vmatpush3.bf16.msra.mxu0 %v1045_v3  ;;  %886 = vmatpush3.bf16.msra.mxu1 %v1045_v3 }
   0xb   :  { %879 = vmatprep.subr.bf16.mxu0 %v998_v2  ;;  %887 = vmatprep.subr.bf16.mxu1 %v998_v2 }
   0xd   :  { %v74_v7 = vld [vmem:[#allocation4] sm:$0xff] }
   0xe   :  { %880 = vmatpush3.bf16.msra.mxu0 %v1048_v4  ;;  %888 = vmatpush3.bf16.msra.mxu1 %v1048_v4  ;;  %v87_v8 = vpack.c.bf16 %v74_v7, %v74_v7 }
   0xf   :  { %893 = vmatprep.subr.bf16.mxu0 %v998_v2  ;;  %901 = vmatprep.subr.bf16.mxu1 %v998_v2 }
  0x11   :  { %882 = vmatmul.mubr.msk.bf16.vlgmr.msra.gmra.mxu0 %vm72_vm1, %v87_v8 }
  0x12   :  { %894 = vmatpush3.bf16.msra.mxu0 %v1045_v3  ;;  %897 = vmatprep.mubr.msk.bf16.mxu0 %vm999_vm0, %v998_v2 }
  0x13   :  { %895 = vmatprep.subr.bf16.mxu0 %v998_v2 }
  0x16   :  { %896 = vmatpush3.bf16.msra.mxu0 %v1048_v4 }
  0x17   :  { %909 = vmatprep.subr.bf16.mxu0 %v998_v2 }
  0x7a   :  { %v1072_v9 = vpop.permute.xlu0 %151 }
  0xd1   :  { %v138_v10 = vpop.f32.mrf.mxu0 }
  0xd2   :  { %v154_v11 = vadd.f32 %v1072_v9, %v138_v10  ;;  %v144_v17 = vadd.f32 %v138_v10, %v86_v16 }
  0xd3   :  { %v883_v12 = vpop.f32.mrf.mxu0 }
  0xd4   :  { %156 = vrot.lane.b32.xlu0 %v154_v11, %s1000_s25  ;;  %v807_v18 = vmul.f32 -1.442695, %v144_v17 }
  0xd5   :  { %v141_v13 = vpop.f32.mrf.mxu0 }
  0xd6   :  { %948 = vpow2.f32 %v807_v18 }
  0xd7   :  { %v884_v14 = vpop.f32.mrf.mxu0 }
  0xd8   :  { %173 = vrot.lane.b32.xlu0 %v74_v7, %s1001_s2 }
  0xe3   :  { %v949_v19 = vpop.eup %948 }
  0xe4   :  { %v148_v20 = vadd.f32 1.0, %v949_v19 }
  0xe6   :  { %950 = vrcp.f32 %v148_v20 }
  0xf3   :  { %v951_v21 = vpop.eup %950 }
  0xf4   :  { %v166_v28 = vsub.f32 1.0, %v951_v21 }
 0x146   :  { %v157_v22 = vpop.permute.xlu0 %156 }
 0x147   :  { %v159_v23 = vmul.f32 %v951_v21, %v157_v22 }
 0x149   :  { %161 = vrot.lane.b32.xlu1 %v159_v23, %s1000_s25 }
 0x14a   :  { %v174_v27 = vpop.permute.xlu0 %173 }
 0x14b   :  { %v176_v30 = vmul.f32 %v951_v21, %v174_v27  ;;  %v357_v27 = vunpack.c.h.bf16 %v814_v63 }
 0x1bb   :  { %v162_v24 = vpop.permute.xlu1 %161 }
 0x1bc   :  { %v164_v25 = vadd.f32 %v162_v24, %v86_v16 }
 0x1be   :  { %952 = vtanh.f32 %v164_v25 }
 0x1cb   :  { %v953_v26 = vpop.eup %952 }
 0x1cc   :  { %168 = vrot.lane.b32.xlu1 %v953_v26, %s1002_s27 }
 0x23e   :  { %v169_v29 = vpop.permute.xlu1 %168 }
 0x23f   :  { %v171_v31 = vmul.f32 %v169_v29, %v166_v28 }
 0x241   :  { %v177_v32 = vadd.f32 %v176_v30, %v171_v31 }
 0x243   :  { %v1081_v33 = vpack.c.bf16 %v177_v32, %v177_v32 }
 0x245   :  { %190 = vrot.lane.b32.xlu1 %v1081_v33, %s1002_s27 }
 0x2b7   :  { %v191_v34 = vpop.permute.xlu1 %190 }
 0x2b8   :  { %890 = vmatmul.mubr.msk.bf16.vlgmr.msra.gmra.mxu1 %vm72_vm1, %v191_v34 }
 0x2b9   :  { %902 = vmatpush3.bf16.msra.mxu1 %v1045_v3  ;;  %905 = vmatprep.mubr.msk.bf16.mxu1 %vm999_vm0, %v998_v2 }
 0x2ba   :  { %903 = vmatprep.subr.bf16.mxu1 %v998_v2 }
 0x2bd   :  { %904 = vmatpush3.bf16.msra.mxu1 %v1048_v4 }
 0x2be   :  { %917 = vmatprep.subr.bf16.mxu1 %v998_v2 }
 0x378   :  { %v229_v35 = vpop.f32.mrf.mxu1 }
 0x379   :  { %v242_v36 = vadd.f32 %v229_v35, %v1072_v9  ;;  %v235_v41 = vadd.f32 %v229_v35, %v189_v40 }
 0x37a   :  { %v891_v37 = vpop.f32.mrf.mxu1 }
 0x37b   :  { %244 = vrot.lane.b32.xlu0 %v242_v36, %s1000_s25  ;;  %v811_v42 = vmul.f32 -1.442695, %v235_v41 }
 0x37c   :  { %v232_v38 = vpop.f32.mrf.mxu1 }
 0x37d   :  { %954 = vpow2.f32 %v811_v42 }
 0x37e   :  { %v892_v39 = vpop.f32.mrf.mxu1 }
 0x38a   :  { %v955_v43 = vpop.eup %954 }
 0x38b   :  { %v239_v44 = vadd.f32 1.0, %v955_v43 }
 0x38d   :  { %956 = vrcp.f32 %v239_v44 }
 0x39a   :  { %v957_v45 = vpop.eup %956 }
 0x39b   :  { %v254_v51 = vsub.f32 1.0, %v957_v45  ;;  %v260_v53 = vmul.f32 %v957_v45, %v177_v32 }
 0x3ed   :  { %v245_v46 = vpop.permute.xlu0 %244 }
 0x3ee   :  { %v247_v47 = vmul.f32 %v957_v45, %v245_v46 }
 0x3f0   :  { %249 = vrot.lane.b32.xlu1 %v247_v47, %s1000_s25 }
 0x462   :  { %v250_v48 = vpop.permute.xlu1 %249 }
 0x463   :  { %v252_v49 = vadd.f32 %v250_v48, %v189_v40 }
 0x465   :  { %958 = vtanh.f32 %v252_v49 }
 0x472   :  { %v959_v50 = vpop.eup %958 }
 0x473   :  { %256 = vrot.lane.b32.xlu0 %v959_v50, %s1002_s27 }
 0x4e5   :  { %v257_v52 = vpop.permute.xlu0 %256 }
 0x4e6   :  { %v259_v54 = vmul.f32 %v257_v52, %v254_v51  ;;  %v824_v51 = vld [vmem:[%s1230_s0 + $0x10] sm:$0xff]  }
 0x4e7   :  { %v441_v52 = vunpack.c.l.bf16 %v824_v51 }
 0x4e8   :  { %v261_v55 = vadd.f32 %v260_v53, %v259_v54 }
 0x4ea   :  { %v1096_v56 = vpack.c.bf16 %v261_v55, %v261_v55 }
 0x4ec   :  { %274 = vrot.lane.b32.xlu1 %v1096_v56, %s1002_s27 }
 0x55e   :  { %v275_v57 = vpop.permute.xlu1 %274 }
 0x55f   :  { %898 = vmatmul.mubr.msk.bf16.vlgmr.msra.gmra.mxu0 %vm72_vm1, %v275_v57 }
 0x560   :  { %910 = vmatpush3.bf16.msra.mxu0 %v1045_v3  ;;  %913 = vmatprep.mubr.msk.bf16.mxu0 %vm999_vm0, %v998_v2 }
 0x561   :  { %911 = vmatprep.subr.bf16.mxu0 %v998_v2 }
 0x564   :  { %912 = vmatpush3.bf16.msra.mxu0 %v1048_v4 }
 0x565   :  { %925 = vmatprep.subr.bf16.mxu0 %v998_v2 }
 0x61f   :  { %v313_v58 = vpop.f32.mrf.mxu0 }
 0x620   :  { %v326_v59 = vadd.f32 %v313_v58, %v1072_v9  ;;  %v319_v1 = vadd.f32 %v313_v58, %v273_v0 }
 0x621   :  { %v899_v60 = vpop.f32.mrf.mxu0 }
 0x622   :  { %328 = vrot.lane.b32.xlu0 %v326_v59, %s1000_s25  ;;  %v816_v5 = vmul.f32 -1.442695, %v319_v1 }
 0x623   :  { %v316_v61 = vpop.f32.mrf.mxu0 }
 0x624   :  { %960 = vpow2.f32 %v816_v5 }
 0x625   :  { %v900_v62 = vpop.f32.mrf.mxu0 }
 0x631   :  { %v961_v6 = vpop.eup %960 }
 0x632   :  { %v323_v7 = vadd.f32 1.0, %v961_v6 }
 0x634   :  { %962 = vrcp.f32 %v323_v7 }
 0x641   :  { %v963_v8 = vpop.eup %962 }
 0x642   :  { %v338_v15 = vsub.f32 1.0, %v963_v8  ;;  %v344_v17 = vmul.f32 %v963_v8, %v261_v55 }
 0x694   :  { %v329_v10 = vpop.permute.xlu0 %328 }
 0x695   :  { %v331_v11 = vmul.f32 %v963_v8, %v329_v10 }
 0x697   :  { %333 = vrot.lane.b32.xlu1 %v331_v11, %s1000_s25 }
 0x709   :  { %v334_v12 = vpop.permute.xlu1 %333 }
 0x70a   :  { %v336_v13 = vadd.f32 %v334_v12, %v273_v0 }
 0x70c   :  { %964 = vtanh.f32 %v336_v13 }
 0x719   :  { %v965_v14 = vpop.eup %964 }
 0x71a   :  { %340 = vrot.lane.b32.xlu0 %v965_v14, %s1002_s27 }
 0x78c   :  { %v341_v16 = vpop.permute.xlu0 %340 }
 0x78d   :  { %v343_v18 = vmul.f32 %v341_v16, %v338_v15  ;;  %v525_v16 = vunpack.c.h.bf16 %v824_v51 }
 0x78f   :  { %v345_v19 = vadd.f32 %v344_v17, %v343_v18 }
 0x791   :  { %v1114_v20 = vpack.c.bf16 %v345_v19, %v345_v19 }
 0x793   :  { %358 = vrot.lane.b32.xlu1 %v1114_v20, %s1002_s27 }
 0x805   :  { %v359_v21 = vpop.permute.xlu1 %358 }
 0x806   :  { %906 = vmatmul.mubr.msk.bf16.vlgmr.msra.gmra.mxu1 %vm72_vm1, %v359_v21 }
 0x807   :  { %918 = vmatpush3.bf16.msra.mxu1 %v1045_v3  ;;  %921 = vmatprep.mubr.msk.bf16.mxu1 %vm999_vm0, %v998_v2 }
 0x808   :  { %919 = vmatprep.subr.bf16.mxu1 %v998_v2 }
 0x80b   :  { %920 = vmatpush3.bf16.msra.mxu1 %v1048_v4 }
 0x80c   :  { %933 = vmatprep.subr.bf16.mxu1 %v998_v2 }
 0x8c6   :  { %v397_v22 = vpop.f32.mrf.mxu1 }
 0x8c7   :  { %v410_v23 = vadd.f32 %v397_v22, %v1072_v9  ;;  %v403_v28 = vadd.f32 %v397_v22, %v357_v27 }
 0x8c8   :  { %v907_v24 = vpop.f32.mrf.mxu1 }
 0x8c9   :  { %412 = vrot.lane.b32.xlu0 %v410_v23, %s1000_s25  ;;  %v821_v29 = vmul.f32 -1.442695, %v403_v28 }
 0x8ca   :  { %v400_v25 = vpop.f32.mrf.mxu1 }
 0x8cb   :  { %966 = vpow2.f32 %v821_v29 }
 0x8cc   :  { %v908_v26 = vpop.f32.mrf.mxu1 }
 0x8d8   :  { %v967_v30 = vpop.eup %966 }
 0x8d9   :  { %v407_v31 = vadd.f32 1.0, %v967_v30 }
 0x8db   :  { %968 = vrcp.f32 %v407_v31 }
 0x8e8   :  { %v969_v32 = vpop.eup %968 }
 0x8e9   :  { %v422_v39 = vsub.f32 1.0, %v969_v32  ;;  %v428_v41 = vmul.f32 %v969_v32, %v345_v19 }
 0x93b   :  { %v413_v34 = vpop.permute.xlu0 %412 }
 0x93c   :  { %v415_v35 = vmul.f32 %v969_v32, %v413_v34 }
 0x93e   :  { %417 = vrot.lane.b32.xlu1 %v415_v35, %s1000_s25 }
 0x9b0   :  { %v418_v36 = vpop.permute.xlu1 %417 }
 0x9b1   :  { %v420_v37 = vadd.f32 %v418_v36, %v357_v27 }
 0x9b3   :  { %970 = vtanh.f32 %v420_v37 }
 0x9c0   :  { %v971_v38 = vpop.eup %970 }
 0x9c1   :  { %424 = vrot.lane.b32.xlu0 %v971_v38, %s1002_s27  ;;  %v834_v38 = vld [vmem:[%s1230_s0 + $0x18] sm:$0xff]  }
 0xa33   :  { %v425_v40 = vpop.permute.xlu0 %424 }
 0xa34   :  { %v427_v42 = vmul.f32 %v425_v40, %v422_v39  ;;  %v609_v39 = vunpack.c.l.bf16 %v834_v38 }
 0xa36   :  { %v429_v43 = vadd.f32 %v428_v41, %v427_v42 }
 0xa38   :  { %v1129_v44 = vpack.c.bf16 %v429_v43, %v429_v43 }
 0xa3a   :  { %442 = vrot.lane.b32.xlu1 %v1129_v44, %s1002_s27 }
 0xaac   :  { %v443_v45 = vpop.permute.xlu1 %442 }
 0xaad   :  { %914 = vmatmul.mubr.msk.bf16.vlgmr.msra.gmra.mxu0 %vm72_vm1, %v443_v45 }
 0xaae   :  { %926 = vmatpush3.bf16.msra.mxu0 %v1045_v3  ;;  %929 = vmatprep.mubr.msk.bf16.mxu0 %vm999_vm0, %v998_v2 }
 0xaaf   :  { %927 = vmatprep.subr.bf16.mxu0 %v998_v2 }
 0xab2   :  { %928 = vmatpush3.bf16.msra.mxu0 %v1048_v4 }
 0xb6d   :  { %v481_v46 = vpop.f32.mrf.mxu0 }
 0xb6e   :  { %v494_v47 = vadd.f32 %v481_v46, %v1072_v9  ;;  %v487_v53 = vadd.f32 %v481_v46, %v441_v52 }
 0xb6f   :  { %v915_v48 = vpop.f32.mrf.mxu0 }
 0xb70   :  { %496 = vrot.lane.b32.xlu0 %v494_v47, %s1000_s25  ;;  %v826_v54 = vmul.f32 -1.442695, %v487_v53 }
 0xb71   :  { %v484_v49 = vpop.f32.mrf.mxu0 }
 0xb72   :  { %972 = vpow2.f32 %v826_v54 }
 0xb73   :  { %v916_v50 = vpop.f32.mrf.mxu0 }
 0xb7f   :  { %v973_v55 = vpop.eup %972 }
 0xb80   :  { %v491_v57 = vadd.f32 1.0, %v973_v55 }
 0xb82   :  { %974 = vrcp.f32 %v491_v57 }
 0xb8f   :  { %v975_v58 = vpop.eup %974 }
 0xb90   :  { %v506_v0 = vsub.f32 1.0, %v975_v58  ;;  %v512_v5 = vmul.f32 %v975_v58, %v429_v43 }
 0xbe2   :  { %v497_v59 = vpop.permute.xlu0 %496 }
 0xbe3   :  { %v499_v60 = vmul.f32 %v975_v58, %v497_v59 }
 0xbe5   :  { %501 = vrot.lane.b32.xlu1 %v499_v60, %s1000_s25 }
 0xc57   :  { %v502_v61 = vpop.permute.xlu1 %501 }
 0xc58   :  { %v504_v62 = vadd.f32 %v502_v61, %v441_v52 }
 0xc5a   :  { %976 = vtanh.f32 %v504_v62 }
 0xc67   :  { %v977_v63 = vpop.eup %976 }
 0xc68   :  { %508 = vrot.lane.b32.xlu0 %v977_v63, %s1002_s27 }
 0xcda   :  { %v509_v1 = vpop.permute.xlu0 %508 }
 0xcdb   :  { %v511_v6 = vmul.f32 %v509_v1, %v506_v0  ;;  %v693_v0 = vunpack.c.h.bf16 %v834_v38 }
 0xcdd   :  { %v513_v7 = vadd.f32 %v512_v5, %v511_v6 }
 0xcdf   :  { %v1146_v8 = vpack.c.bf16 %v513_v7, %v513_v7 }
 0xce1   :  { %526 = vrot.lane.b32.xlu1 %v1146_v8, %s1002_s27 }
 0xd53   :  { %v527_v10 = vpop.permute.xlu1 %526 }
 0xd54   :  { %922 = vmatmul.mubr.msk.bf16.vlgmr.msra.gmra.mxu1 %vm72_vm1, %v527_v10 }
 0xd55   :  { %934 = vmatpush3.bf16.msra.mxu1 %v1045_v3  ;;  %937 = vmatprep.mubr.msk.bf16.mxu1 %vm999_vm0, %v998_v2 }
 0xd56   :  { %935 = vmatprep.subr.bf16.mxu1 %v998_v2 }
 0xd59   :  { %936 = vmatpush3.bf16.msra.mxu1 %v1048_v4 }
 0xe14   :  { %v565_v11 = vpop.f32.mrf.mxu1 }
 0xe15   :  { %v578_v12 = vadd.f32 %v565_v11, %v1072_v9  ;;  %v571_v17 = vadd.f32 %v565_v11, %v525_v16 }
 0xe16   :  { %v923_v13 = vpop.f32.mrf.mxu1 }
 0xe17   :  { %580 = vrot.lane.b32.xlu0 %v578_v12, %s1000_s25  ;;  %v831_v18 = vmul.f32 -1.442695, %v571_v17 }
 0xe18   :  { %v568_v14 = vpop.f32.mrf.mxu1 }
 0xe19   :  { %978 = vpow2.f32 %v831_v18 }
 0xe1a   :  { %v924_v15 = vpop.f32.mrf.mxu1 }
 0xe26   :  { %v979_v3 = vpop.eup %978 }
 0xe27   :  { %v575_v19 = vadd.f32 1.0, %v979_v3 }
 0xe29   :  { %980 = vrcp.f32 %v575_v19 }
 0xe36   :  { %v981_v21 = vpop.eup %980 }
 0xe37   :  { %v590_v25 = vsub.f32 1.0, %v981_v21  ;;  %v596_v27 = vmul.f32 %v981_v21, %v513_v7 }
 0xe89   :  { %v581_v22 = vpop.permute.xlu0 %580 }
 0xe8a   :  { %v583_v2 = vmul.f32 %v981_v21, %v581_v22 }
 0xe8c   :  { %585 = vrot.lane.b32.xlu1 %v583_v2, %s1000_s25 }
 0xefe   :  { %v586_v4 = vpop.permute.xlu1 %585 }
 0xeff   :  { %v588_v23 = vadd.f32 %v586_v4, %v525_v16 }
 0xf01   :  { %982 = vtanh.f32 %v588_v23 }
 0xf0e   :  { %v983_v24 = vpop.eup %982 }
 0xf0f   :  { %592 = vrot.lane.b32.xlu0 %v983_v24, %s1002_s27 }
 0xf81   :  { %v593_v26 = vpop.permute.xlu0 %592 }
 0xf82   :  { %v595_v28 = vmul.f32 %v593_v26, %v590_v25 }
 0xf84   :  { %v597_v29 = vadd.f32 %v596_v27, %v595_v28 }
 0xf86   :  { %v1160_v30 = vpack.c.bf16 %v597_v29, %v597_v29 }
 0xf88   :  { %610 = vrot.lane.b32.xlu1 %v1160_v30, %s1002_s27 }
 0xffa   :  { %v611_v31 = vpop.permute.xlu1 %610 }
 0xffb   :  { %930 = vmatmul.mubr.msk.bf16.vlgmr.msra.gmra.mxu0 %vm72_vm1, %v611_v31 }
0x10bb   :  { %v649_v32 = vpop.f32.mrf.mxu0 }
0x10bc   :  { %v662_v34 = vadd.f32 %v649_v32, %v1072_v9  ;;  %v655_v40 = vadd.f32 %v649_v32, %v609_v39 }
0x10bd   :  { %v931_v35 = vpop.f32.mrf.mxu0 }
0x10be   :  { %664 = vrot.lane.b32.xlu0 %v662_v34, %s1000_s25  ;;  %v836_v41 = vmul.f32 -1.442695, %v655_v40 }
0x10bf   :  { %v652_v36 = vpop.f32.mrf.mxu0 }
0x10c0   :  { %984 = vpow2.f32 %v836_v41 }
0x10c1   :  { %v932_v37 = vpop.f32.mrf.mxu0 }
0x10cd   :  { %v985_v42 = vpop.eup %984 }
0x10ce   :  { %v659_v43 = vadd.f32 1.0, %v985_v42 }
0x10d0   :  { %986 = vrcp.f32 %v659_v43 }
0x10dd   :  { %v987_v45 = vpop.eup %986 }
0x10de   :  { %v674_v51 = vsub.f32 1.0, %v987_v45  ;;  %v680_v53 = vmul.f32 %v987_v45, %v597_v29 }
0x1130   :  { %v665_v46 = vpop.permute.xlu0 %664 }
0x1131   :  { %v667_v47 = vmul.f32 %v987_v45, %v665_v46 }
0x1133   :  { %669 = vrot.lane.b32.xlu1 %v667_v47, %s1000_s25 }
0x11a5   :  { %v670_v48 = vpop.permute.xlu1 %669 }
0x11a6   :  { %v672_v49 = vadd.f32 %v670_v48, %v609_v39 }
0x11a8   :  { %988 = vtanh.f32 %v672_v49 }
0x11b5   :  { %v989_v50 = vpop.eup %988 }
0x11b6   :  { %676 = vrot.lane.b32.xlu0 %v989_v50, %s1002_s27 }
0x1228   :  { %v677_v52 = vpop.permute.xlu0 %676 }
0x1229   :  { %v679_v54 = vmul.f32 %v677_v52, %v674_v51 }
0x122b   :  { %v681_v55 = vadd.f32 %v680_v53, %v679_v54 }
0x122d   :  { %v682_v57 = vpack.c.bf16 %v681_v55, %v681_v55 }
0x122f   :  { %694 = vrot.lane.b32.xlu1 %v682_v57, %s1002_s27 }
0x12a1   :  { %v695_v58 = vpop.permute.xlu1 %694 }
0x12a2   :  { %938 = vmatmul.mubr.msk.bf16.vlgmr.msra.gmra.mxu1 %vm72_vm1, %v695_v58 }
0x1362   :  { %v733_v59 = vpop.f32.mrf.mxu1 }
0x1363   :  { %v746_v60 = vadd.f32 %v733_v59, %v1072_v9  ;;  %v739_v1 = vadd.f32 %v733_v59, %v693_v0 }
0x1364   :  { %v939_v61 = vpop.f32.mrf.mxu1 }
0x1365   :  { %748 = vrot.lane.b32.xlu0 %v746_v60, %s1000_s25  ;;  %v841_v5 = vmul.f32 -1.442695, %v739_v1 }
0x1366   :  { %v736_v62 = vpop.f32.mrf.mxu1 }
0x1367   :  { %990 = vpow2.f32 %v841_v5 }
0x1368   :  { %v940_v63 = vpop.f32.mrf.mxu1 }
0x1374   :  { %v991_v6 = vpop.eup %990 }
0x1375   :  { %v743_v7 = vadd.f32 1.0, %v991_v6 }
0x1377   :  { %992 = vrcp.f32 %v743_v7 }
0x1384   :  { %v993_v10 = vpop.eup %992 }
0x1385   :  { %v758_v16 = vsub.f32 1.0, %v993_v10  ;;  %v764_v18 = vmul.f32 %v993_v10, %v681_v55 }
0x13d7   :  { %v749_v11 = vpop.permute.xlu0 %748 }
0x13d8   :  { %v751_v12 = vmul.f32 %v993_v10, %v749_v11 }
0x13da   :  { %753 = vrot.lane.b32.xlu1 %v751_v12, %s1000_s25 }
0x13de   :  { %182 = vrot.lane.b32.xlu1 %v1081_v33, %s1002_s27 }
0x13e2   :  { %350 = vrot.lane.b32.xlu1 %v1114_v20, %s1002_s27 }
0x13e6   :  { %518 = vrot.lane.b32.xlu1 %v1146_v8, %s1002_s27 }
0x13ea   :  { %686 = vrot.lane.b32.xlu1 %v682_v57, %s1002_s27 }
0x144c   :  { %v754_v9 = vpop.permute.xlu1 %753 }
0x144d   :  { %v756_v13 = vadd.f32 %v754_v9, %v693_v0 }
0x144f   :  { %994 = vtanh.f32 %v756_v13 }
0x1450   :  { %v183_v14 = vpop.permute.xlu1 %182 }
0x1451   :  { %186 = vst.msk [vmem:[%s1234_s4] sm:$0xf] %vm185_vm2, %v183_v14 }
0x1454   :  { %v351_v15 = vpop.permute.xlu1 %350 }
0x1455   :  { %818 = vst.msk [vmem:[%s1234_s4 + $0x8] sm:$0xf] %vm185_vm2, %v351_v15 }
0x1458   :  { %v519_v33 = vpop.permute.xlu1 %518 }
0x1459   :  { %828 = vst.msk [vmem:[%s1234_s4 + $0x10] sm:$0xf] %vm185_vm2, %v519_v33 }
0x145c   :  { %v995_v20 = vpop.eup %994  ;;  %v687_v8 = vpop.permute.xlu1 %686 }
0x145d   :  { %838 = vst.msk [vmem:[%s1234_s4 + $0x18] sm:$0xf] %vm185_vm2, %v687_v8  ;;  %760 = vrot.lane.b32.xlu0 %v995_v20, %s1002_s27 }
0x1461   :  { %266 = vrot.lane.b32.xlu0 %v1096_v56, %s1002_s27 }
0x1465   :  { %434 = vrot.lane.b32.xlu0 %v1129_v44, %s1002_s27 }
0x1469   :  { %602 = vrot.lane.b32.xlu0 %v1160_v30, %s1002_s27 }
0x14cf   :  { %v761_v17 = vpop.permute.xlu0 %760 }
0x14d0   :  { %v763_v3 = vmul.f32 %v761_v17, %v758_v16 }
0x14d2   :  { %v765_v19 = vadd.f32 %v764_v18, %v763_v3 }
0x14d3   :  { %v267_v21 = vpop.permute.xlu0 %266 }
0x14d4   :  { %813 = vst.msk [vmem:[%s1234_s4 + $0x4] sm:$0xf] %vm185_vm2, %v267_v21  ;;  %776 = vrot.lane.b32.xlu1 %v765_v19, %s1002_s27  ;;  %v852_v56 = vpack.c.bf16 %v765_v19, %v765_v19 }
0x14d6   :  { %770 = vrot.lane.b32.xlu0 %v852_v56, %s1002_s27 }
0x14d7   :  { %v435_v44 = vpop.permute.xlu0 %434 }
0x14d8   :  { %823 = vst.msk [vmem:[%s1234_s4 + $0xc] sm:$0xf] %vm185_vm2, %v435_v44 }
0x14db   :  { %v603_v22 = vpop.permute.xlu0 %602 }
0x14dc   :  { %833 = vst.msk [vmem:[%s1234_s4 + $0x14] sm:$0xf] %vm185_vm2, %v603_v22 }
0x1546   :  { %v777_v2 = vpop.permute.xlu1 %776 }
0x1547   :  { %779 = vst.msk [vmem:[#allocation4] sm:$0xff] %vm72_vm1, %v777_v2  ;;  %780 = vst.msk [vmem:[%s1235_s5] sm:$0xff] %vm72_vm1, %v777_v2 }
0x1548   :  { %v771_v4 = vpop.permute.xlu0 %770 }
0x1549   :  { %843 = vst.msk [vmem:[%s1234_s4 + $0x1c] sm:$0xf] %vm185_vm2, %v771_v4 }
0x154a   :  { %789 = vsyncmov [#allocation3] }
0x154d   :  { %s790_s25 = vpop.sfrf %789 }
0x154e   :  { %p844_p0 = scmp.ne.s32.totalorder %s790_s25, 0 }
0x1550   :  { %794 = shalt.err (%p844_p0)  }

</bundles_post_ra>
